<compile_context>
chip_gen: v7x
topology: tpu7x:2x2x1
jax: 0.10.0
libtpu: 0.0.40
codegen_flags: <defaults>
</compile_context>

<pallas_src>
import functools
import math

import jax
import jax.numpy as jnp
from jax.experimental import pallas as pl
from jax.experimental.pallas import tpu as pltpu


def _spatial_attention_kernel(x_ref, w_ref, bn_ref, o_ref, pf_ref, *,
                              ksize, height, width):
    # x_ref  : (1, C, H*W)      VMEM  -- one image, lane-dense last dim
    # w_ref  : (2*K*K,)  f32    SMEM  -- conv weight, index [c*K*K + kh*K + kw]
    # bn_ref : (2,)      f32    SMEM  -- folded BatchNorm [scale, shift]
    # o_ref  : (1, C, H*W)      VMEM
    # pf_ref : (2, 1, L) f32    VMEM scratch -- flat zero-padded [max, mean] maps
    K = ksize
    P = (K - 1) // 2
    H, W = height, width
    _, C, HW = x_ref.shape
    FP = P * W + P                        # flat front/back pad length
    L = HW + 2 * FP

    # ---- 1) fused channel max + sum: ONE pass over C, chunked over sublanes ----
    CB = math.gcd(C, 8)
    mx = jnp.full((CB, HW), -jnp.inf, jnp.float32)
    sm = jnp.zeros((CB, HW), jnp.float32)
    for i in range(C // CB):              # each chunk read once, dies immediately
        blk = x_ref[0, i * CB:(i + 1) * CB, :].astype(jnp.float32)
        mx = jnp.maximum(mx, blk)
        sm = sm + blk
    x_max = jnp.max(mx, axis=0, keepdims=True)                 # (1, HW)
    x_mean = jnp.sum(sm, axis=0, keepdims=True) * (1.0 / C)    # (1, HW)

    # ---- 2) flat zero-padded compressed maps (zero only the borders) ----
    if FP > 0:
        zpad = jnp.zeros((1, FP), jnp.float32)
        for c in range(2):
            pf_ref[c, :, 0:FP] = zpad
            pf_ref[c, :, FP + HW:L] = zpad
    pf_ref[0, :, FP:FP + HW] = x_max
    pf_ref[1, :, FP:FP + HW] = x_mean

    # ---- 3) KxK conv over the 2 compressed channels, in flat space.
    #      Tap (dh,dw): read pf at offset dh*W+dw; out-of-row columns are masked,
    #      out-of-image rows land in the zero padding.  7 independent chains. ----
    col = jax.lax.broadcasted_iota(jnp.int32, (1, HW), 1) % W
    total = jnp.zeros((1, HW), jnp.float32)
    for dw in range(-P, P + 1):
        g = jnp.zeros((1, HW), jnp.float32)
        for c in range(2):
            for dh in range(-P, P + 1):
                start = FP + dh * W + dw
                wv = w_ref[c * K * K + (dh + P) * K + (dw + P)]
                g = g + wv * pf_ref[c, :, start:start + HW]
        if dw != 0:                       # mask columns that wrapped across rows
            lo = max(0, -dw)
            hi = W - max(0, dw)
            g = jnp.where((col >= lo) & (col < hi), g, 0.0)
        total = total + g

    # ---- 4) folded BatchNorm + sigmoid, then rescale (re-index x_ref here) ----
    att = jax.nn.sigmoid(total * bn_ref[0] + bn_ref[1])        # (1, HW)
    o_ref[0] = (x_ref[0].astype(jnp.float32) * att).astype(o_ref.dtype)


def spatial_attention(x, conv_w, gamma, beta, running_mean, running_var,
                      *, eps=1e-5):
    """x: (B, C, H, W).  conv_w: (1, 2, K, K).  BN params: shape (1,)."""
    B, C, H, W = x.shape
    K = conv_w.shape[-1]
    P = (K - 1) // 2
    HW = H * W
    FP = P * W + P
    L = HW + 2 * FP

    # Fold BatchNorm2d(1) (inference statistics) into a scalar affine.
    scale = gamma / jnp.sqrt(running_var + eps)
    shift = beta - running_mean * scale
    bn = jnp.concatenate([scale.reshape(1), shift.reshape(1)]).astype(jnp.float32)
    w_flat = conv_w.reshape(-1).astype(jnp.float32)             # (2*K*K,)

    # Lane-dense layout for the big elementwise path (free, contiguous reshape).
    x2d = x.reshape(B, C, HW)

    itemsize = jnp.dtype(x.dtype).itemsize
    vmem_need = 4 * C * HW * itemsize + 2 * L * 4 + (1 << 20)   # dbl-buffered in+out
    vmem_limit = int(min(max(vmem_need * 5 // 4, 32 << 20), 64 << 20))

    cost = pl.CostEstimate(
        flops=int(3 * B * C * HW + 2 * (2 * K * K + 2) * B * HW),
        transcendentals=int(B * HW),
        bytes_accessed=int(2 * B * C * HW * itemsize),
    )

    kernel = functools.partial(_spatial_attention_kernel,
                               ksize=K, height=H, width=W)
    out2d = pl.pallas_call(
        kernel,
        out_shape=jax.ShapeDtypeStruct((B, C, HW), x.dtype),
        grid_spec=pltpu.PrefetchScalarGridSpec(
            num_scalar_prefetch=0,
            grid=(B,),
            in_specs=[
                pl.BlockSpec((1, C, HW), lambda b: (b, 0, 0)),
                pl.BlockSpec(memory_space=pltpu.MemorySpace.SMEM),   # conv weights
                pl.BlockSpec(memory_space=pltpu.MemorySpace.SMEM),   # BN scale/shift
            ],
            out_specs=pl.BlockSpec((1, C, HW), lambda b: (b, 0, 0)),
            scratch_shapes=[pltpu.VMEM((2, 1, L), jnp.float32)],
        ),
        compiler_params=pltpu.CompilerParams(
            dimension_semantics=("parallel",),
            vmem_limit_bytes=vmem_limit),
        cost_estimate=cost,
    )(x2d, w_flat, bn)
    return out2d.reshape(B, C, H, W)


def _reference(x, conv_w, gamma, beta, running_mean, running_var, eps=1e-5):
    """Pure-JAX reference mirroring the PyTorch forward (inference BN)."""
    B, C, H, W = x.shape
    K = conv_w.shape[-1]
    P = (K - 1) // 2
    xf = x.astype(jnp.float32)
    comp = jnp.stack([jnp.max(xf, axis=1), jnp.mean(xf, axis=1)], axis=1)
    comp_p = jnp.pad(comp, ((0, 0), (0, 0), (P, P), (P, P)))
    acc = jnp.zeros((B, H, W), jnp.float32)
    for c in range(2):
        for kh in range(K):
            for kw in range(K):
                acc = acc + conv_w[0, c, kh, kw] * comp_p[:, c, kh:kh + H, kw:kw + W]
    scale = gamma / jnp.sqrt(running_var + eps)
    shift = beta - running_mean * scale
    att = jax.nn.sigmoid(acc * scale[0] + shift[0])
    return (xf * att[:, None, :, :]).astype(x.dtype)


if __name__ == "__main__":
    key = jax.random.PRNGKey(0)
    kx, kw, kg, kb = jax.random.split(key, 4)

    B, C, H, W = 2, 4, 16, 16
    K = 7

    x = jax.random.normal(kx, (B, C, H, W), dtype=jnp.float32)
    conv_w = jax.random.normal(kw, (1, 2, K, K), dtype=jnp.float32) * 0.1
    gamma = 1.0 + 0.1 * jax.random.normal(kg, (1,), dtype=jnp.float32)
    beta = 0.1 * jax.random.normal(kb, (1,), dtype=jnp.float32)
    running_mean = jnp.zeros((1,), jnp.float32)
    running_var = jnp.ones((1,), jnp.float32)

    out = spatial_attention(x, conv_w, gamma, beta, running_mean, running_var)
    jax.block_until_ready(out)

    ref = _reference(x, conv_w, gamma, beta, running_mean, running_var)
    assert out.shape == (B, C, H, W)
    assert out.dtype == x.dtype
    assert bool(jnp.all(jnp.isfinite(out)))
    assert bool(jnp.allclose(out, ref, atol=1e-4, rtol=1e-4))

    print("KERNEL_OK")
</pallas_src>

<mosaic_0001>
module attributes {stable_mosaic.version = 11 : i64} {
  func.func @_spatial_attention_kernel(%arg0: i32, %arg1: memref<1x4x256xf32, #tpu.memory_space<vmem>>, %arg2: memref<98xf32, #tpu.memory_space<smem>>, %arg3: memref<2xf32, #tpu.memory_space<smem>>, %arg4: memref<1x4x256xf32, #tpu.memory_space<vmem>>, %arg5: memref<2x1x358xf32, #tpu.memory_space<vmem>>) attributes {dimension_semantics = [#tpu.dimension_semantics<parallel>], iteration_bounds = array<i64: 2>, scalar_prefetch = 0 : i64, scratch_operands = 1 : i64, tpu.core_type = #tpu.core_type<tc>, window_params = [{transform_indices = @transform_0, window_bounds = array<i64: 1, 4, 256>}, {transform_indices = @transform_1, window_bounds = array<i64: 98>}, {transform_indices = @transform_2, window_bounds = array<i64: 2>}, {transform_indices = @transform_3, window_bounds = array<i64: 1, 4, 256>}]} {
    %cst = arith.constant 0xFF800000 : f32
    %0 = vector.broadcast %cst : f32 to vector<4x256xf32>
    %cst_0 = arith.constant 0.000000e+00 : f32
    %1 = vector.broadcast %cst_0 : f32 to vector<4x256xf32>
    %c0 = arith.constant 0 : index
    %c0_1 = arith.constant 0 : index
    %c0_2 = arith.constant 0 : index
    %2 = vector.load %arg1[%c0, %c0_1, %c0_2] : memref<1x4x256xf32, #tpu.memory_space<vmem>>, vector<1x4x256xf32>
    %3 = vector.shape_cast %2 : vector<1x4x256xf32> to vector<4x256xf32>
    %4 = arith.maximumf %0, %3 : vector<4x256xf32>
    %5 = arith.addf %1, %3 : vector<4x256xf32>
    %cst_3 = arith.constant dense<0xFF800000> : vector<256xf32>
    %6 = vector.multi_reduction <maximumf>, %4, %cst_3 [0] : vector<4x256xf32> to vector<256xf32>
    %7 = vector.shape_cast %6 : vector<256xf32> to vector<1x256xf32>
    %cst_4 = arith.constant dense<0.000000e+00> : vector<256xf32>
    %8 = vector.multi_reduction <add>, %5, %cst_4 [0] : vector<4x256xf32> to vector<256xf32>
    %9 = vector.shape_cast %8 : vector<256xf32> to vector<1x256xf32>
    %cst_5 = arith.constant 2.500000e-01 : f32
    %10 = vector.broadcast %cst_5 : f32 to vector<1x256xf32>
    %11 = arith.mulf %9, %10 : vector<1x256xf32>
    %cst_6 = arith.constant 0.000000e+00 : f32
    %12 = vector.broadcast %cst_6 : f32 to vector<1x51xf32>
    %c0_7 = arith.constant 0 : index
    %c0_8 = arith.constant 0 : index
    %c0_9 = arith.constant 0 : index
    %13 = vector.load %arg5[%c0_7, %c0_8, %c0_9] : memref<2x1x358xf32, #tpu.memory_space<vmem>>, vector<1x1x51xf32>
    %14 = vector.shape_cast %13 : vector<1x1x51xf32> to vector<1x51xf32>
    %15 = vector.shape_cast %12 : vector<1x51xf32> to vector<1x1x51xf32>
    tpu.vector_store %arg5[%c0_7, %c0_8, %c0_9], %15 {strides = array<i32>} : memref<2x1x358xf32, #tpu.memory_space<vmem>>, vector<1x1x51xf32>,
    %c0_10 = arith.constant 0 : index
    %c0_11 = arith.constant 0 : index
    %c307 = arith.constant 307 : index
    %16 = vector.load %arg5[%c0_10, %c0_11, %c307] : memref<2x1x358xf32, #tpu.memory_space<vmem>>, vector<1x1x51xf32>
    %17 = vector.shape_cast %16 : vector<1x1x51xf32> to vector<1x51xf32>
    %18 = vector.shape_cast %12 : vector<1x51xf32> to vector<1x1x51xf32>
    tpu.vector_store %arg5[%c0_10, %c0_11, %c307], %18 {strides = array<i32>} : memref<2x1x358xf32, #tpu.memory_space<vmem>>, vector<1x1x51xf32>,
    %c1 = arith.constant 1 : index
    %c0_12 = arith.constant 0 : index
    %c0_13 = arith.constant 0 : index
    %19 = vector.load %arg5[%c1, %c0_12, %c0_13] : memref<2x1x358xf32, #tpu.memory_space<vmem>>, vector<1x1x51xf32>
    %20 = vector.shape_cast %19 : vector<1x1x51xf32> to vector<1x51xf32>
    %21 = vector.shape_cast %12 : vector<1x51xf32> to vector<1x1x51xf32>
    tpu.vector_store %arg5[%c1, %c0_12, %c0_13], %21 {strides = array<i32>} : memref<2x1x358xf32, #tpu.memory_space<vmem>>, vector<1x1x51xf32>,
    %c1_14 = arith.constant 1 : index
    %c0_15 = arith.constant 0 : index
    %c307_16 = arith.constant 307 : index
    %22 = vector.load %arg5[%c1_14, %c0_15, %c307_16] : memref<2x1x358xf32, #tpu.memory_space<vmem>>, vector<1x1x51xf32>
    %23 = vector.shape_cast %22 : vector<1x1x51xf32> to vector<1x51xf32>
    %24 = vector.shape_cast %12 : vector<1x51xf32> to vector<1x1x51xf32>
    tpu.vector_store %arg5[%c1_14, %c0_15, %c307_16], %24 {strides = array<i32>} : memref<2x1x358xf32, #tpu.memory_space<vmem>>, vector<1x1x51xf32>,
    %c0_17 = arith.constant 0 : index
    %c0_18 = arith.constant 0 : index
    %c51 = arith.constant 51 : index
    %25 = vector.load %arg5[%c0_17, %c0_18, %c51] : memref<2x1x358xf32, #tpu.memory_space<vmem>>, vector<1x1x256xf32>
    %26 = vector.shape_cast %25 : vector<1x1x256xf32> to vector<1x256xf32>
    %27 = vector.shape_cast %7 : vector<1x256xf32> to vector<1x1x256xf32>
    tpu.vector_store %arg5[%c0_17, %c0_18, %c51], %27 {strides = array<i32>} : memref<2x1x358xf32, #tpu.memory_space<vmem>>, vector<1x1x256xf32>,
    %c1_19 = arith.constant 1 : index
    %c0_20 = arith.constant 0 : index
    %c51_21 = arith.constant 51 : index
    %28 = vector.load %arg5[%c1_19, %c0_20, %c51_21] : memref<2x1x358xf32, #tpu.memory_space<vmem>>, vector<1x1x256xf32>
    %29 = vector.shape_cast %28 : vector<1x1x256xf32> to vector<1x256xf32>
    %30 = vector.shape_cast %11 : vector<1x256xf32> to vector<1x1x256xf32>
    tpu.vector_store %arg5[%c1_19, %c0_20, %c51_21], %30 {strides = array<i32>} : memref<2x1x358xf32, #tpu.memory_space<vmem>>, vector<1x1x256xf32>,
    %31 = tpu.iota {dimensions = array<i32: 1>} : vector<1x256xi32>
    %c16_i32 = arith.constant 16 : i32
    %c0_i32 = arith.constant 0 : i32
    %32 = arith.cmpi eq, %c16_i32, %c0_i32 : i32
    %c1_i32 = arith.constant 1 : i32
    %33 = arith.select %32, %c1_i32, %c16_i32 : i32
    %34 = vector.broadcast %33 : i32 to vector<1x256xi32>
    %35 = arith.remsi %31, %34 : vector<1x256xi32>
    %c0_i32_22 = arith.constant 0 : i32
    %36 = vector.broadcast %c0_i32_22 : i32 to vector<1x256xi32>
    %37 = arith.cmpi ne, %35, %36 : vector<1x256xi32>
    %c0_i32_23 = arith.constant 0 : i32
    %38 = vector.broadcast %c0_i32_23 : i32 to vector<1x256xi32>
    %39 = arith.cmpi slt, %35, %38 : vector<1x256xi32>
    %c0_i32_24 = arith.constant 0 : i32
    %40 = arith.cmpi slt, %33, %c0_i32_24 : i32
    %41 = vector.broadcast %40 : i1 to vector<1x256xi1>
    %42 = vector.broadcast %41 : vector<1x256xi1> to vector<1x256xi1>
    %43 = arith.xori %39, %42 : vector<1x256xi1>
    %44 = arith.andi %43, %37 : vector<1x256xi1>
    %45 = vector.broadcast %33 : i32 to vector<1x256xi32>
    %46 = arith.addi %35, %45 : vector<1x256xi32>
    %47 = arith.select %44, %46, %35 : vector<1x256xi1>, vector<1x256xi32>
    %cst_25 = arith.constant 0.000000e+00 : f32
    %48 = vector.broadcast %cst_25 : f32 to vector<1x256xf32>
    %cst_26 = arith.constant 0.000000e+00 : f32
    %49 = vector.broadcast %cst_26 : f32 to vector<1x256xf32>
    %c0_27 = arith.constant 0 : index
    %50 = memref.load %arg2[%c0_27] : memref<98xf32, #tpu.memory_space<smem>>
    %c0_28 = arith.constant 0 : index
    %c0_29 = arith.constant 0 : index
    %c0_30 = arith.constant 0 : index
    %51 = vector.load %arg5[%c0_28, %c0_29, %c0_30] : memref<2x1x358xf32, #tpu.memory_space<vmem>>, vector<1x1x256xf32>
    %52 = vector.shape_cast %51 : vector<1x1x256xf32> to vector<1x256xf32>
    %53 = vector.broadcast %50 : f32 to vector<1x256xf32>
    %54 = arith.mulf %53, %52 : vector<1x256xf32>
    %55 = arith.addf %49, %54 : vector<1x256xf32>
    %c7 = arith.constant 7 : index
    %56 = memref.load %arg2[%c7] : memref<98xf32, #tpu.memory_space<smem>>
    %c0_31 = arith.constant 0 : index
    %c0_32 = arith.constant 0 : index
    %c16 = arith.constant 16 : index
    %57 = vector.load %arg5[%c0_31, %c0_32, %c16] : memref<2x1x358xf32, #tpu.memory_space<vmem>>, vector<1x1x256xf32>
    %58 = vector.shape_cast %57 : vector<1x1x256xf32> to vector<1x256xf32>
    %59 = vector.broadcast %56 : f32 to vector<1x256xf32>
    %60 = arith.mulf %59, %58 : vector<1x256xf32>
    %61 = arith.addf %55, %60 : vector<1x256xf32>
    %c14 = arith.constant 14 : index
    %62 = memref.load %arg2[%c14] : memref<98xf32, #tpu.memory_space<smem>>
    %c0_33 = arith.constant 0 : index
    %c0_34 = arith.constant 0 : index
    %c32 = arith.constant 32 : index
    %63 = vector.load %arg5[%c0_33, %c0_34, %c32] : memref<2x1x358xf32, #tpu.memory_space<vmem>>, vector<1x1x256xf32>
    %64 = vector.shape_cast %63 : vector<1x1x256xf32> to vector<1x256xf32>
    %65 = vector.broadcast %62 : f32 to vector<1x256xf32>
    %66 = arith.mulf %65, %64 : vector<1x256xf32>
    %67 = arith.addf %61, %66 : vector<1x256xf32>
    %c21 = arith.constant 21 : index
    %68 = memref.load %arg2[%c21] : memref<98xf32, #tpu.memory_space<smem>>
    %c0_35 = arith.constant 0 : index
    %c0_36 = arith.constant 0 : index
    %c48 = arith.constant 48 : index
    %69 = vector.load %arg5[%c0_35, %c0_36, %c48] : memref<2x1x358xf32, #tpu.memory_space<vmem>>, vector<1x1x256xf32>
    %70 = vector.shape_cast %69 : vector<1x1x256xf32> to vector<1x256xf32>
    %71 = vector.broadcast %68 : f32 to vector<1x256xf32>
    %72 = arith.mulf %71, %70 : vector<1x256xf32>
    %73 = arith.addf %67, %72 : vector<1x256xf32>
    %c28 = arith.constant 28 : index
    %74 = memref.load %arg2[%c28] : memref<98xf32, #tpu.memory_space<smem>>
    %c0_37 = arith.constant 0 : index
    %c0_38 = arith.constant 0 : index
    %c64 = arith.constant 64 : index
    %75 = vector.load %arg5[%c0_37, %c0_38, %c64] : memref<2x1x358xf32, #tpu.memory_space<vmem>>, vector<1x1x256xf32>
    %76 = vector.shape_cast %75 : vector<1x1x256xf32> to vector<1x256xf32>
    %77 = vector.broadcast %74 : f32 to vector<1x256xf32>
    %78 = arith.mulf %77, %76 : vector<1x256xf32>
    %79 = arith.addf %73, %78 : vector<1x256xf32>
    %c35 = arith.constant 35 : index
    %80 = memref.load %arg2[%c35] : memref<98xf32, #tpu.memory_space<smem>>
    %c0_39 = arith.constant 0 : index
    %c0_40 = arith.constant 0 : index
    %c80 = arith.constant 80 : index
    %81 = vector.load %arg5[%c0_39, %c0_40, %c80] : memref<2x1x358xf32, #tpu.memory_space<vmem>>, vector<1x1x256xf32>
    %82 = vector.shape_cast %81 : vector<1x1x256xf32> to vector<1x256xf32>
    %83 = vector.broadcast %80 : f32 to vector<1x256xf32>
    %84 = arith.mulf %83, %82 : vector<1x256xf32>
    %85 = arith.addf %79, %84 : vector<1x256xf32>
    %c42 = arith.constant 42 : index
    %86 = memref.load %arg2[%c42] : memref<98xf32, #tpu.memory_space<smem>>
    %c0_41 = arith.constant 0 : index
    %c0_42 = arith.constant 0 : index
    %c96 = arith.constant 96 : index
    %87 = vector.load %arg5[%c0_41, %c0_42, %c96] : memref<2x1x358xf32, #tpu.memory_space<vmem>>, vector<1x1x256xf32>
    %88 = vector.shape_cast %87 : vector<1x1x256xf32> to vector<1x256xf32>
    %89 = vector.broadcast %86 : f32 to vector<1x256xf32>
    %90 = arith.mulf %89, %88 : vector<1x256xf32>
    %91 = arith.addf %85, %90 : vector<1x256xf32>
    %c49 = arith.constant 49 : index
    %92 = memref.load %arg2[%c49] : memref<98xf32, #tpu.memory_space<smem>>
    %c1_43 = arith.constant 1 : index
    %c0_44 = arith.constant 0 : index
    %c0_45 = arith.constant 0 : index
    %93 = vector.load %arg5[%c1_43, %c0_44, %c0_45] : memref<2x1x358xf32, #tpu.memory_space<vmem>>, vector<1x1x256xf32>
    %94 = vector.shape_cast %93 : vector<1x1x256xf32> to vector<1x256xf32>
    %95 = vector.broadcast %92 : f32 to vector<1x256xf32>
    %96 = arith.mulf %95, %94 : vector<1x256xf32>
    %97 = arith.addf %91, %96 : vector<1x256xf32>
    %c56 = arith.constant 56 : index
    %98 = memref.load %arg2[%c56] : memref<98xf32, #tpu.memory_space<smem>>
    %c1_46 = arith.constant 1 : index
    %c0_47 = arith.constant 0 : index
    %c16_48 = arith.constant 16 : index
    %99 = vector.load %arg5[%c1_46, %c0_47, %c16_48] : memref<2x1x358xf32, #tpu.memory_space<vmem>>, vector<1x1x256xf32>
    %100 = vector.shape_cast %99 : vector<1x1x256xf32> to vector<1x256xf32>
    %101 = vector.broadcast %98 : f32 to vector<1x256xf32>
    %102 = arith.mulf %101, %100 : vector<1x256xf32>
    %103 = arith.addf %97, %102 : vector<1x256xf32>
    %c63 = arith.constant 63 : index
    %104 = memref.load %arg2[%c63] : memref<98xf32, #tpu.memory_space<smem>>
    %c1_49 = arith.constant 1 : index
    %c0_50 = arith.constant 0 : index
    %c32_51 = arith.constant 32 : index
    %105 = vector.load %arg5[%c1_49, %c0_50, %c32_51] : memref<2x1x358xf32, #tpu.memory_space<vmem>>, vector<1x1x256xf32>
    %106 = vector.shape_cast %105 : vector<1x1x256xf32> to vector<1x256xf32>
    %107 = vector.broadcast %104 : f32 to vector<1x256xf32>
    %108 = arith.mulf %107, %106 : vector<1x256xf32>
    %109 = arith.addf %103, %108 : vector<1x256xf32>
    %c70 = arith.constant 70 : index
    %110 = memref.load %arg2[%c70] : memref<98xf32, #tpu.memory_space<smem>>
    %c1_52 = arith.constant 1 : index
    %c0_53 = arith.constant 0 : index
    %c48_54 = arith.constant 48 : index
    %111 = vector.load %arg5[%c1_52, %c0_53, %c48_54] : memref<2x1x358xf32, #tpu.memory_space<vmem>>, vector<1x1x256xf32>
    %112 = vector.shape_cast %111 : vector<1x1x256xf32> to vector<1x256xf32>
    %113 = vector.broadcast %110 : f32 to vector<1x256xf32>
    %114 = arith.mulf %113, %112 : vector<1x256xf32>
    %115 = arith.addf %109, %114 : vector<1x256xf32>
    %c77 = arith.constant 77 : index
    %116 = memref.load %arg2[%c77] : memref<98xf32, #tpu.memory_space<smem>>
    %c1_55 = arith.constant 1 : index
    %c0_56 = arith.constant 0 : index
    %c64_57 = arith.constant 64 : index
    %117 = vector.load %arg5[%c1_55, %c0_56, %c64_57] : memref<2x1x358xf32, #tpu.memory_space<vmem>>, vector<1x1x256xf32>
    %118 = vector.shape_cast %117 : vector<1x1x256xf32> to vector<1x256xf32>
    %119 = vector.broadcast %116 : f32 to vector<1x256xf32>
    %120 = arith.mulf %119, %118 : vector<1x256xf32>
    %121 = arith.addf %115, %120 : vector<1x256xf32>
    %c84 = arith.constant 84 : index
    %122 = memref.load %arg2[%c84] : memref<98xf32, #tpu.memory_space<smem>>
    %c1_58 = arith.constant 1 : index
    %c0_59 = arith.constant 0 : index
    %c80_60 = arith.constant 80 : index
    %123 = vector.load %arg5[%c1_58, %c0_59, %c80_60] : memref<2x1x358xf32, #tpu.memory_space<vmem>>, vector<1x1x256xf32>
    %124 = vector.shape_cast %123 : vector<1x1x256xf32> to vector<1x256xf32>
    %125 = vector.broadcast %122 : f32 to vector<1x256xf32>
    %126 = arith.mulf %125, %124 : vector<1x256xf32>
    %127 = arith.addf %121, %126 : vector<1x256xf32>
    %c91 = arith.constant 91 : index
    %128 = memref.load %arg2[%c91] : memref<98xf32, #tpu.memory_space<smem>>
    %c1_61 = arith.constant 1 : index
    %c0_62 = arith.constant 0 : index
    %c96_63 = arith.constant 96 : index
    %129 = vector.load %arg5[%c1_61, %c0_62, %c96_63] : memref<2x1x358xf32, #tpu.memory_space<vmem>>, vector<1x1x256xf32>
    %130 = vector.shape_cast %129 : vector<1x1x256xf32> to vector<1x256xf32>
    %131 = vector.broadcast %128 : f32 to vector<1x256xf32>
    %132 = arith.mulf %131, %130 : vector<1x256xf32>
    %133 = arith.addf %127, %132 : vector<1x256xf32>
    %c3_i32 = arith.constant 3 : i32
    %134 = vector.broadcast %c3_i32 : i32 to vector<1x256xi32>
    %135 = arith.cmpi sge, %47, %134 : vector<1x256xi32>
    %c16_i32_64 = arith.constant 16 : i32
    %136 = vector.broadcast %c16_i32_64 : i32 to vector<1x256xi32>
    %137 = arith.cmpi slt, %47, %136 : vector<1x256xi32>
    %138 = arith.andi %135, %137 : vector<1x256xi1>
    %cst_65 = arith.constant 0.000000e+00 : f32
    %139 = vector.broadcast %cst_65 : f32 to vector<1x256xf32>
    %140 = arith.select %138, %133, %139 : vector<1x256xi1>, vector<1x256xf32>
    %141 = arith.addf %48, %140 : vector<1x256xf32>
    %cst_66 = arith.constant 0.000000e+00 : f32
    %142 = vector.broadcast %cst_66 : f32 to vector<1x256xf32>
    %c1_67 = arith.constant 1 : index
    %143 = memref.load %arg2[%c1_67] : memref<98xf32, #tpu.memory_space<smem>>
    %c0_68 = arith.constant 0 : index
    %c0_69 = arith.constant 0 : index
    %c1_70 = arith.constant 1 : index
    %144 = vector.load %arg5[%c0_68, %c0_69, %c1_70] : memref<2x1x358xf32, #tpu.memory_space<vmem>>, vector<1x1x256xf32>
    %145 = vector.shape_cast %144 : vector<1x1x256xf32> to vector<1x256xf32>
    %146 = vector.broadcast %143 : f32 to vector<1x256xf32>
    %147 = arith.mulf %146, %145 : vector<1x256xf32>
    %148 = arith.addf %142, %147 : vector<1x256xf32>
    %c8 = arith.constant 8 : index
    %149 = memref.load %arg2[%c8] : memref<98xf32, #tpu.memory_space<smem>>
    %c0_71 = arith.constant 0 : index
    %c0_72 = arith.constant 0 : index
    %c17 = arith.constant 17 : index
    %150 = vector.load %arg5[%c0_71, %c0_72, %c17] : memref<2x1x358xf32, #tpu.memory_space<vmem>>, vector<1x1x256xf32>
    %151 = vector.shape_cast %150 : vector<1x1x256xf32> to vector<1x256xf32>
    %152 = vector.broadcast %149 : f32 to vector<1x256xf32>
    %153 = arith.mulf %152, %151 : vector<1x256xf32>
    %154 = arith.addf %148, %153 : vector<1x256xf32>
    %c15 = arith.constant 15 : index
    %155 = memref.load %arg2[%c15] : memref<98xf32, #tpu.memory_space<smem>>
    %c0_73 = arith.constant 0 : index
    %c0_74 = arith.constant 0 : index
    %c33 = arith.constant 33 : index
    %156 = vector.load %arg5[%c0_73, %c0_74, %c33] : memref<2x1x358xf32, #tpu.memory_space<vmem>>, vector<1x1x256xf32>
    %157 = vector.shape_cast %156 : vector<1x1x256xf32> to vector<1x256xf32>
    %158 = vector.broadcast %155 : f32 to vector<1x256xf32>
    %159 = arith.mulf %158, %157 : vector<1x256xf32>
    %160 = arith.addf %154, %159 : vector<1x256xf32>
    %c22 = arith.constant 22 : index
    %161 = memref.load %arg2[%c22] : memref<98xf32, #tpu.memory_space<smem>>
    %c0_75 = arith.constant 0 : index
    %c0_76 = arith.constant 0 : index
    %c49_77 = arith.constant 49 : index
    %162 = vector.load %arg5[%c0_75, %c0_76, %c49_77] : memref<2x1x358xf32, #tpu.memory_space<vmem>>, vector<1x1x256xf32>
    %163 = vector.shape_cast %162 : vector<1x1x256xf32> to vector<1x256xf32>
    %164 = vector.broadcast %161 : f32 to vector<1x256xf32>
    %165 = arith.mulf %164, %163 : vector<1x256xf32>
    %166 = arith.addf %160, %165 : vector<1x256xf32>
    %c29 = arith.constant 29 : index
    %167 = memref.load %arg2[%c29] : memref<98xf32, #tpu.memory_space<smem>>
    %c0_78 = arith.constant 0 : index
    %c0_79 = arith.constant 0 : index
    %c65 = arith.constant 65 : index
    %168 = vector.load %arg5[%c0_78, %c0_79, %c65] : memref<2x1x358xf32, #tpu.memory_space<vmem>>, vector<1x1x256xf32>
    %169 = vector.shape_cast %168 : vector<1x1x256xf32> to vector<1x256xf32>
    %170 = vector.broadcast %167 : f32 to vector<1x256xf32>
    %171 = arith.mulf %170, %169 : vector<1x256xf32>
    %172 = arith.addf %166, %171 : vector<1x256xf32>
    %c36 = arith.constant 36 : index
    %173 = memref.load %arg2[%c36] : memref<98xf32, #tpu.memory_space<smem>>
    %c0_80 = arith.constant 0 : index
    %c0_81 = arith.constant 0 : index
    %c81 = arith.constant 81 : index
    %174 = vector.load %arg5[%c0_80, %c0_81, %c81] : memref<2x1x358xf32, #tpu.memory_space<vmem>>, vector<1x1x256xf32>
    %175 = vector.shape_cast %174 : vector<1x1x256xf32> to vector<1x256xf32>
    %176 = vector.broadcast %173 : f32 to vector<1x256xf32>
    %177 = arith.mulf %176, %175 : vector<1x256xf32>
    %178 = arith.addf %172, %177 : vector<1x256xf32>
    %c43 = arith.constant 43 : index
    %179 = memref.load %arg2[%c43] : memref<98xf32, #tpu.memory_space<smem>>
    %c0_82 = arith.constant 0 : index
    %c0_83 = arith.constant 0 : index
    %c97 = arith.constant 97 : index
    %180 = vector.load %arg5[%c0_82, %c0_83, %c97] : memref<2x1x358xf32, #tpu.memory_space<vmem>>, vector<1x1x256xf32>
    %181 = vector.shape_cast %180 : vector<1x1x256xf32> to vector<1x256xf32>
    %182 = vector.broadcast %179 : f32 to vector<1x256xf32>
    %183 = arith.mulf %182, %181 : vector<1x256xf32>
    %184 = arith.addf %178, %183 : vector<1x256xf32>
    %c50 = arith.constant 50 : index
    %185 = memref.load %arg2[%c50] : memref<98xf32, #tpu.memory_space<smem>>
    %c1_84 = arith.constant 1 : index
    %c0_85 = arith.constant 0 : index
    %c1_86 = arith.constant 1 : index
    %186 = vector.load %arg5[%c1_84, %c0_85, %c1_86] : memref<2x1x358xf32, #tpu.memory_space<vmem>>, vector<1x1x256xf32>
    %187 = vector.shape_cast %186 : vector<1x1x256xf32> to vector<1x256xf32>
    %188 = vector.broadcast %185 : f32 to vector<1x256xf32>
    %189 = arith.mulf %188, %187 : vector<1x256xf32>
    %190 = arith.addf %184, %189 : vector<1x256xf32>
    %c57 = arith.constant 57 : index
    %191 = memref.load %arg2[%c57] : memref<98xf32, #tpu.memory_space<smem>>
    %c1_87 = arith.constant 1 : index
    %c0_88 = arith.constant 0 : index
    %c17_89 = arith.constant 17 : index
    %192 = vector.load %arg5[%c1_87, %c0_88, %c17_89] : memref<2x1x358xf32, #tpu.memory_space<vmem>>, vector<1x1x256xf32>
    %193 = vector.shape_cast %192 : vector<1x1x256xf32> to vector<1x256xf32>
    %194 = vector.broadcast %191 : f32 to vector<1x256xf32>
    %195 = arith.mulf %194, %193 : vector<1x256xf32>
    %196 = arith.addf %190, %195 : vector<1x256xf32>
    %c64_90 = arith.constant 64 : index
    %197 = memref.load %arg2[%c64_90] : memref<98xf32, #tpu.memory_space<smem>>
    %c1_91 = arith.constant 1 : index
    %c0_92 = arith.constant 0 : index
    %c33_93 = arith.constant 33 : index
    %198 = vector.load %arg5[%c1_91, %c0_92, %c33_93] : memref<2x1x358xf32, #tpu.memory_space<vmem>>, vector<1x1x256xf32>
    %199 = vector.shape_cast %198 : vector<1x1x256xf32> to vector<1x256xf32>
    %200 = vector.broadcast %197 : f32 to vector<1x256xf32>
    %201 = arith.mulf %200, %199 : vector<1x256xf32>
    %202 = arith.addf %196, %201 : vector<1x256xf32>
    %c71 = arith.constant 71 : index
    %203 = memref.load %arg2[%c71] : memref<98xf32, #tpu.memory_space<smem>>
    %c1_94 = arith.constant 1 : index
    %c0_95 = arith.constant 0 : index
    %c49_96 = arith.constant 49 : index
    %204 = vector.load %arg5[%c1_94, %c0_95, %c49_96] : memref<2x1x358xf32, #tpu.memory_space<vmem>>, vector<1x1x256xf32>
    %205 = vector.shape_cast %204 : vector<1x1x256xf32> to vector<1x256xf32>
    %206 = vector.broadcast %203 : f32 to vector<1x256xf32>
    %207 = arith.mulf %206, %205 : vector<1x256xf32>
    %208 = arith.addf %202, %207 : vector<1x256xf32>
    %c78 = arith.constant 78 : index
    %209 = memref.load %arg2[%c78] : memref<98xf32, #tpu.memory_space<smem>>
    %c1_97 = arith.constant 1 : index
    %c0_98 = arith.constant 0 : index
    %c65_99 = arith.constant 65 : index
    %210 = vector.load %arg5[%c1_97, %c0_98, %c65_99] : memref<2x1x358xf32, #tpu.memory_space<vmem>>, vector<1x1x256xf32>
    %211 = vector.shape_cast %210 : vector<1x1x256xf32> to vector<1x256xf32>
    %212 = vector.broadcast %209 : f32 to vector<1x256xf32>
    %213 = arith.mulf %212, %211 : vector<1x256xf32>
    %214 = arith.addf %208, %213 : vector<1x256xf32>
    %c85 = arith.constant 85 : index
    %215 = memref.load %arg2[%c85] : memref<98xf32, #tpu.memory_space<smem>>
    %c1_100 = arith.constant 1 : index
    %c0_101 = arith.constant 0 : index
    %c81_102 = arith.constant 81 : index
    %216 = vector.load %arg5[%c1_100, %c0_101, %c81_102] : memref<2x1x358xf32, #tpu.memory_space<vmem>>, vector<1x1x256xf32>
    %217 = vector.shape_cast %216 : vector<1x1x256xf32> to vector<1x256xf32>
    %218 = vector.broadcast %215 : f32 to vector<1x256xf32>
    %219 = arith.mulf %218, %217 : vector<1x256xf32>
    %220 = arith.addf %214, %219 : vector<1x256xf32>
    %c92 = arith.constant 92 : index
    %221 = memref.load %arg2[%c92] : memref<98xf32, #tpu.memory_space<smem>>
    %c1_103 = arith.constant 1 : index
    %c0_104 = arith.constant 0 : index
    %c97_105 = arith.constant 97 : index
    %222 = vector.load %arg5[%c1_103, %c0_104, %c97_105] : memref<2x1x358xf32, #tpu.memory_space<vmem>>, vector<1x1x256xf32>
    %223 = vector.shape_cast %222 : vector<1x1x256xf32> to vector<1x256xf32>
    %224 = vector.broadcast %221 : f32 to vector<1x256xf32>
    %225 = arith.mulf %224, %223 : vector<1x256xf32>
    %226 = arith.addf %220, %225 : vector<1x256xf32>
    %c2_i32 = arith.constant 2 : i32
    %227 = vector.broadcast %c2_i32 : i32 to vector<1x256xi32>
    %228 = arith.cmpi sge, %47, %227 : vector<1x256xi32>
    %c16_i32_106 = arith.constant 16 : i32
    %229 = vector.broadcast %c16_i32_106 : i32 to vector<1x256xi32>
    %230 = arith.cmpi slt, %47, %229 : vector<1x256xi32>
    %231 = arith.andi %228, %230 : vector<1x256xi1>
    %cst_107 = arith.constant 0.000000e+00 : f32
    %232 = vector.broadcast %cst_107 : f32 to vector<1x256xf32>
    %233 = arith.select %231, %226, %232 : vector<1x256xi1>, vector<1x256xf32>
    %234 = arith.addf %141, %233 : vector<1x256xf32>
    %cst_108 = arith.constant 0.000000e+00 : f32
    %235 = vector.broadcast %cst_108 : f32 to vector<1x256xf32>
    %c2 = arith.constant 2 : index
    %236 = memref.load %arg2[%c2] : memref<98xf32, #tpu.memory_space<smem>>
    %c0_109 = arith.constant 0 : index
    %c0_110 = arith.constant 0 : index
    %c2_111 = arith.constant 2 : index
    %237 = vector.load %arg5[%c0_109, %c0_110, %c2_111] : memref<2x1x358xf32, #tpu.memory_space<vmem>>, vector<1x1x256xf32>
    %238 = vector.shape_cast %237 : vector<1x1x256xf32> to vector<1x256xf32>
    %239 = vector.broadcast %236 : f32 to vector<1x256xf32>
    %240 = arith.mulf %239, %238 : vector<1x256xf32>
    %241 = arith.addf %235, %240 : vector<1x256xf32>
    %c9 = arith.constant 9 : index
    %242 = memref.load %arg2[%c9] : memref<98xf32, #tpu.memory_space<smem>>
    %c0_112 = arith.constant 0 : index
    %c0_113 = arith.constant 0 : index
    %c18 = arith.constant 18 : index
    %243 = vector.load %arg5[%c0_112, %c0_113, %c18] : memref<2x1x358xf32, #tpu.memory_space<vmem>>, vector<1x1x256xf32>
    %244 = vector.shape_cast %243 : vector<1x1x256xf32> to vector<1x256xf32>
    %245 = vector.broadcast %242 : f32 to vector<1x256xf32>
    %246 = arith.mulf %245, %244 : vector<1x256xf32>
    %247 = arith.addf %241, %246 : vector<1x256xf32>
    %c16_114 = arith.constant 16 : index
    %248 = memref.load %arg2[%c16_114] : memref<98xf32, #tpu.memory_space<smem>>
    %c0_115 = arith.constant 0 : index
    %c0_116 = arith.constant 0 : index
    %c34 = arith.constant 34 : index
    %249 = vector.load %arg5[%c0_115, %c0_116, %c34] : memref<2x1x358xf32, #tpu.memory_space<vmem>>, vector<1x1x256xf32>
    %250 = vector.shape_cast %249 : vector<1x1x256xf32> to vector<1x256xf32>
    %251 = vector.broadcast %248 : f32 to vector<1x256xf32>
    %252 = arith.mulf %251, %250 : vector<1x256xf32>
    %253 = arith.addf %247, %252 : vector<1x256xf32>
    %c23 = arith.constant 23 : index
    %254 = memref.load %arg2[%c23] : memref<98xf32, #tpu.memory_space<smem>>
    %c0_117 = arith.constant 0 : index
    %c0_118 = arith.constant 0 : index
    %c50_119 = arith.constant 50 : index
    %255 = vector.load %arg5[%c0_117, %c0_118, %c50_119] : memref<2x1x358xf32, #tpu.memory_space<vmem>>, vector<1x1x256xf32>
    %256 = vector.shape_cast %255 : vector<1x1x256xf32> to vector<1x256xf32>
    %257 = vector.broadcast %254 : f32 to vector<1x256xf32>
    %258 = arith.mulf %257, %256 : vector<1x256xf32>
    %259 = arith.addf %253, %258 : vector<1x256xf32>
    %c30 = arith.constant 30 : index
    %260 = memref.load %arg2[%c30] : memref<98xf32, #tpu.memory_space<smem>>
    %c0_120 = arith.constant 0 : index
    %c0_121 = arith.constant 0 : index
    %c66 = arith.constant 66 : index
    %261 = vector.load %arg5[%c0_120, %c0_121, %c66] : memref<2x1x358xf32, #tpu.memory_space<vmem>>, vector<1x1x256xf32>
    %262 = vector.shape_cast %261 : vector<1x1x256xf32> to vector<1x256xf32>
    %263 = vector.broadcast %260 : f32 to vector<1x256xf32>
    %264 = arith.mulf %263, %262 : vector<1x256xf32>
    %265 = arith.addf %259, %264 : vector<1x256xf32>
    %c37 = arith.constant 37 : index
    %266 = memref.load %arg2[%c37] : memref<98xf32, #tpu.memory_space<smem>>
    %c0_122 = arith.constant 0 : index
    %c0_123 = arith.constant 0 : index
    %c82 = arith.constant 82 : index
    %267 = vector.load %arg5[%c0_122, %c0_123, %c82] : memref<2x1x358xf32, #tpu.memory_space<vmem>>, vector<1x1x256xf32>
    %268 = vector.shape_cast %267 : vector<1x1x256xf32> to vector<1x256xf32>
    %269 = vector.broadcast %266 : f32 to vector<1x256xf32>
    %270 = arith.mulf %269, %268 : vector<1x256xf32>
    %271 = arith.addf %265, %270 : vector<1x256xf32>
    %c44 = arith.constant 44 : index
    %272 = memref.load %arg2[%c44] : memref<98xf32, #tpu.memory_space<smem>>
    %c0_124 = arith.constant 0 : index
    %c0_125 = arith.constant 0 : index
    %c98 = arith.constant 98 : index
    %273 = vector.load %arg5[%c0_124, %c0_125, %c98] : memref<2x1x358xf32, #tpu.memory_space<vmem>>, vector<1x1x256xf32>
    %274 = vector.shape_cast %273 : vector<1x1x256xf32> to vector<1x256xf32>
    %275 = vector.broadcast %272 : f32 to vector<1x256xf32>
    %276 = arith.mulf %275, %274 : vector<1x256xf32>
    %277 = arith.addf %271, %276 : vector<1x256xf32>
    %c51_126 = arith.constant 51 : index
    %278 = memref.load %arg2[%c51_126] : memref<98xf32, #tpu.memory_space<smem>>
    %c1_127 = arith.constant 1 : index
    %c0_128 = arith.constant 0 : index
    %c2_129 = arith.constant 2 : index
    %279 = vector.load %arg5[%c1_127, %c0_128, %c2_129] : memref<2x1x358xf32, #tpu.memory_space<vmem>>, vector<1x1x256xf32>
    %280 = vector.shape_cast %279 : vector<1x1x256xf32> to vector<1x256xf32>
    %281 = vector.broadcast %278 : f32 to vector<1x256xf32>
    %282 = arith.mulf %281, %280 : vector<1x256xf32>
    %283 = arith.addf %277, %282 : vector<1x256xf32>
    %c58 = arith.constant 58 : index
    %284 = memref.load %arg2[%c58] : memref<98xf32, #tpu.memory_space<smem>>
    %c1_130 = arith.constant 1 : index
    %c0_131 = arith.constant 0 : index
    %c18_132 = arith.constant 18 : index
    %285 = vector.load %arg5[%c1_130, %c0_131, %c18_132] : memref<2x1x358xf32, #tpu.memory_space<vmem>>, vector<1x1x256xf32>
    %286 = vector.shape_cast %285 : vector<1x1x256xf32> to vector<1x256xf32>
    %287 = vector.broadcast %284 : f32 to vector<1x256xf32>
    %288 = arith.mulf %287, %286 : vector<1x256xf32>
    %289 = arith.addf %283, %288 : vector<1x256xf32>
    %c65_133 = arith.constant 65 : index
    %290 = memref.load %arg2[%c65_133] : memref<98xf32, #tpu.memory_space<smem>>
    %c1_134 = arith.constant 1 : index
    %c0_135 = arith.constant 0 : index
    %c34_136 = arith.constant 34 : index
    %291 = vector.load %arg5[%c1_134, %c0_135, %c34_136] : memref<2x1x358xf32, #tpu.memory_space<vmem>>, vector<1x1x256xf32>
    %292 = vector.shape_cast %291 : vector<1x1x256xf32> to vector<1x256xf32>
    %293 = vector.broadcast %290 : f32 to vector<1x256xf32>
    %294 = arith.mulf %293, %292 : vector<1x256xf32>
    %295 = arith.addf %289, %294 : vector<1x256xf32>
    %c72 = arith.constant 72 : index
    %296 = memref.load %arg2[%c72] : memref<98xf32, #tpu.memory_space<smem>>
    %c1_137 = arith.constant 1 : index
    %c0_138 = arith.constant 0 : index
    %c50_139 = arith.constant 50 : index
    %297 = vector.load %arg5[%c1_137, %c0_138, %c50_139] : memref<2x1x358xf32, #tpu.memory_space<vmem>>, vector<1x1x256xf32>
    %298 = vector.shape_cast %297 : vector<1x1x256xf32> to vector<1x256xf32>
    %299 = vector.broadcast %296 : f32 to vector<1x256xf32>
    %300 = arith.mulf %299, %298 : vector<1x256xf32>
    %301 = arith.addf %295, %300 : vector<1x256xf32>
    %c79 = arith.constant 79 : index
    %302 = memref.load %arg2[%c79] : memref<98xf32, #tpu.memory_space<smem>>
    %c1_140 = arith.constant 1 : index
    %c0_141 = arith.constant 0 : index
    %c66_142 = arith.constant 66 : index
    %303 = vector.load %arg5[%c1_140, %c0_141, %c66_142] : memref<2x1x358xf32, #tpu.memory_space<vmem>>, vector<1x1x256xf32>
    %304 = vector.shape_cast %303 : vector<1x1x256xf32> to vector<1x256xf32>
    %305 = vector.broadcast %302 : f32 to vector<1x256xf32>
    %306 = arith.mulf %305, %304 : vector<1x256xf32>
    %307 = arith.addf %301, %306 : vector<1x256xf32>
    %c86 = arith.constant 86 : index
    %308 = memref.load %arg2[%c86] : memref<98xf32, #tpu.memory_space<smem>>
    %c1_143 = arith.constant 1 : index
    %c0_144 = arith.constant 0 : index
    %c82_145 = arith.constant 82 : index
    %309 = vector.load %arg5[%c1_143, %c0_144, %c82_145] : memref<2x1x358xf32, #tpu.memory_space<vmem>>, vector<1x1x256xf32>
    %310 = vector.shape_cast %309 : vector<1x1x256xf32> to vector<1x256xf32>
    %311 = vector.broadcast %308 : f32 to vector<1x256xf32>
    %312 = arith.mulf %311, %310 : vector<1x256xf32>
    %313 = arith.addf %307, %312 : vector<1x256xf32>
    %c93 = arith.constant 93 : index
    %314 = memref.load %arg2[%c93] : memref<98xf32, #tpu.memory_space<smem>>
    %c1_146 = arith.constant 1 : index
    %c0_147 = arith.constant 0 : index
    %c98_148 = arith.constant 98 : index
    %315 = vector.load %arg5[%c1_146, %c0_147, %c98_148] : memref<2x1x358xf32, #tpu.memory_space<vmem>>, vector<1x1x256xf32>
    %316 = vector.shape_cast %315 : vector<1x1x256xf32> to vector<1x256xf32>
    %317 = vector.broadcast %314 : f32 to vector<1x256xf32>
    %318 = arith.mulf %317, %316 : vector<1x256xf32>
    %319 = arith.addf %313, %318 : vector<1x256xf32>
    %c1_i32_149 = arith.constant 1 : i32
    %320 = vector.broadcast %c1_i32_149 : i32 to vector<1x256xi32>
    %321 = arith.cmpi sge, %47, %320 : vector<1x256xi32>
    %c16_i32_150 = arith.constant 16 : i32
    %322 = vector.broadcast %c16_i32_150 : i32 to vector<1x256xi32>
    %323 = arith.cmpi slt, %47, %322 : vector<1x256xi32>
    %324 = arith.andi %321, %323 : vector<1x256xi1>
    %cst_151 = arith.constant 0.000000e+00 : f32
    %325 = vector.broadcast %cst_151 : f32 to vector<1x256xf32>
    %326 = arith.select %324, %319, %325 : vector<1x256xi1>, vector<1x256xf32>
    %327 = arith.addf %234, %326 : vector<1x256xf32>
    %cst_152 = arith.constant 0.000000e+00 : f32
    %328 = vector.broadcast %cst_152 : f32 to vector<1x256xf32>
    %c3 = arith.constant 3 : index
    %329 = memref.load %arg2[%c3] : memref<98xf32, #tpu.memory_space<smem>>
    %c0_153 = arith.constant 0 : index
    %c0_154 = arith.constant 0 : index
    %c3_155 = arith.constant 3 : index
    %330 = vector.load %arg5[%c0_153, %c0_154, %c3_155] : memref<2x1x358xf32, #tpu.memory_space<vmem>>, vector<1x1x256xf32>
    %331 = vector.shape_cast %330 : vector<1x1x256xf32> to vector<1x256xf32>
    %332 = vector.broadcast %329 : f32 to vector<1x256xf32>
    %333 = arith.mulf %332, %331 : vector<1x256xf32>
    %334 = arith.addf %328, %333 : vector<1x256xf32>
    %c10 = arith.constant 10 : index
    %335 = memref.load %arg2[%c10] : memref<98xf32, #tpu.memory_space<smem>>
    %c0_156 = arith.constant 0 : index
    %c0_157 = arith.constant 0 : index
    %c19 = arith.constant 19 : index
    %336 = vector.load %arg5[%c0_156, %c0_157, %c19] : memref<2x1x358xf32, #tpu.memory_space<vmem>>, vector<1x1x256xf32>
    %337 = vector.shape_cast %336 : vector<1x1x256xf32> to vector<1x256xf32>
    %338 = vector.broadcast %335 : f32 to vector<1x256xf32>
    %339 = arith.mulf %338, %337 : vector<1x256xf32>
    %340 = arith.addf %334, %339 : vector<1x256xf32>
    %c17_158 = arith.constant 17 : index
    %341 = memref.load %arg2[%c17_158] : memref<98xf32, #tpu.memory_space<smem>>
    %c0_159 = arith.constant 0 : index
    %c0_160 = arith.constant 0 : index
    %c35_161 = arith.constant 35 : index
    %342 = vector.load %arg5[%c0_159, %c0_160, %c35_161] : memref<2x1x358xf32, #tpu.memory_space<vmem>>, vector<1x1x256xf32>
    %343 = vector.shape_cast %342 : vector<1x1x256xf32> to vector<1x256xf32>
    %344 = vector.broadcast %341 : f32 to vector<1x256xf32>
    %345 = arith.mulf %344, %343 : vector<1x256xf32>
    %346 = arith.addf %340, %345 : vector<1x256xf32>
    %c24 = arith.constant 24 : index
    %347 = memref.load %arg2[%c24] : memref<98xf32, #tpu.memory_space<smem>>
    %c0_162 = arith.constant 0 : index
    %c0_163 = arith.constant 0 : index
    %c51_164 = arith.constant 51 : index
    %348 = vector.load %arg5[%c0_162, %c0_163, %c51_164] : memref<2x1x358xf32, #tpu.memory_space<vmem>>, vector<1x1x256xf32>
    %349 = vector.shape_cast %348 : vector<1x1x256xf32> to vector<1x256xf32>
    %350 = vector.broadcast %347 : f32 to vector<1x256xf32>
    %351 = arith.mulf %350, %349 : vector<1x256xf32>
    %352 = arith.addf %346, %351 : vector<1x256xf32>
    %c31 = arith.constant 31 : index
    %353 = memref.load %arg2[%c31] : memref<98xf32, #tpu.memory_space<smem>>
    %c0_165 = arith.constant 0 : index
    %c0_166 = arith.constant 0 : index
    %c67 = arith.constant 67 : index
    %354 = vector.load %arg5[%c0_165, %c0_166, %c67] : memref<2x1x358xf32, #tpu.memory_space<vmem>>, vector<1x1x256xf32>
    %355 = vector.shape_cast %354 : vector<1x1x256xf32> to vector<1x256xf32>
    %356 = vector.broadcast %353 : f32 to vector<1x256xf32>
    %357 = arith.mulf %356, %355 : vector<1x256xf32>
    %358 = arith.addf %352, %357 : vector<1x256xf32>
    %c38 = arith.constant 38 : index
    %359 = memref.load %arg2[%c38] : memref<98xf32, #tpu.memory_space<smem>>
    %c0_167 = arith.constant 0 : index
    %c0_168 = arith.constant 0 : index
    %c83 = arith.constant 83 : index
    %360 = vector.load %arg5[%c0_167, %c0_168, %c83] : memref<2x1x358xf32, #tpu.memory_space<vmem>>, vector<1x1x256xf32>
    %361 = vector.shape_cast %360 : vector<1x1x256xf32> to vector<1x256xf32>
    %362 = vector.broadcast %359 : f32 to vector<1x256xf32>
    %363 = arith.mulf %362, %361 : vector<1x256xf32>
    %364 = arith.addf %358, %363 : vector<1x256xf32>
    %c45 = arith.constant 45 : index
    %365 = memref.load %arg2[%c45] : memref<98xf32, #tpu.memory_space<smem>>
    %c0_169 = arith.constant 0 : index
    %c0_170 = arith.constant 0 : index
    %c99 = arith.constant 99 : index
    %366 = vector.load %arg5[%c0_169, %c0_170, %c99] : memref<2x1x358xf32, #tpu.memory_space<vmem>>, vector<1x1x256xf32>
    %367 = vector.shape_cast %366 : vector<1x1x256xf32> to vector<1x256xf32>
    %368 = vector.broadcast %365 : f32 to vector<1x256xf32>
    %369 = arith.mulf %368, %367 : vector<1x256xf32>
    %370 = arith.addf %364, %369 : vector<1x256xf32>
    %c52 = arith.constant 52 : index
    %371 = memref.load %arg2[%c52] : memref<98xf32, #tpu.memory_space<smem>>
    %c1_171 = arith.constant 1 : index
    %c0_172 = arith.constant 0 : index
    %c3_173 = arith.constant 3 : index
    %372 = vector.load %arg5[%c1_171, %c0_172, %c3_173] : memref<2x1x358xf32, #tpu.memory_space<vmem>>, vector<1x1x256xf32>
    %373 = vector.shape_cast %372 : vector<1x1x256xf32> to vector<1x256xf32>
    %374 = vector.broadcast %371 : f32 to vector<1x256xf32>
    %375 = arith.mulf %374, %373 : vector<1x256xf32>
    %376 = arith.addf %370, %375 : vector<1x256xf32>
    %c59 = arith.constant 59 : index
    %377 = memref.load %arg2[%c59] : memref<98xf32, #tpu.memory_space<smem>>
    %c1_174 = arith.constant 1 : index
    %c0_175 = arith.constant 0 : index
    %c19_176 = arith.constant 19 : index
    %378 = vector.load %arg5[%c1_174, %c0_175, %c19_176] : memref<2x1x358xf32, #tpu.memory_space<vmem>>, vector<1x1x256xf32>
    %379 = vector.shape_cast %378 : vector<1x1x256xf32> to vector<1x256xf32>
    %380 = vector.broadcast %377 : f32 to vector<1x256xf32>
    %381 = arith.mulf %380, %379 : vector<1x256xf32>
    %382 = arith.addf %376, %381 : vector<1x256xf32>
    %c66_177 = arith.constant 66 : index
    %383 = memref.load %arg2[%c66_177] : memref<98xf32, #tpu.memory_space<smem>>
    %c1_178 = arith.constant 1 : index
    %c0_179 = arith.constant 0 : index
    %c35_180 = arith.constant 35 : index
    %384 = vector.load %arg5[%c1_178, %c0_179, %c35_180] : memref<2x1x358xf32, #tpu.memory_space<vmem>>, vector<1x1x256xf32>
    %385 = vector.shape_cast %384 : vector<1x1x256xf32> to vector<1x256xf32>
    %386 = vector.broadcast %383 : f32 to vector<1x256xf32>
    %387 = arith.mulf %386, %385 : vector<1x256xf32>
    %388 = arith.addf %382, %387 : vector<1x256xf32>
    %c73 = arith.constant 73 : index
    %389 = memref.load %arg2[%c73] : memref<98xf32, #tpu.memory_space<smem>>
    %c1_181 = arith.constant 1 : index
    %c0_182 = arith.constant 0 : index
    %c51_183 = arith.constant 51 : index
    %390 = vector.load %arg5[%c1_181, %c0_182, %c51_183] : memref<2x1x358xf32, #tpu.memory_space<vmem>>, vector<1x1x256xf32>
    %391 = vector.shape_cast %390 : vector<1x1x256xf32> to vector<1x256xf32>
    %392 = vector.broadcast %389 : f32 to vector<1x256xf32>
    %393 = arith.mulf %392, %391 : vector<1x256xf32>
    %394 = arith.addf %388, %393 : vector<1x256xf32>
    %c80_184 = arith.constant 80 : index
    %395 = memref.load %arg2[%c80_184] : memref<98xf32, #tpu.memory_space<smem>>
    %c1_185 = arith.constant 1 : index
    %c0_186 = arith.constant 0 : index
    %c67_187 = arith.constant 67 : index
    %396 = vector.load %arg5[%c1_185, %c0_186, %c67_187] : memref<2x1x358xf32, #tpu.memory_space<vmem>>, vector<1x1x256xf32>
    %397 = vector.shape_cast %396 : vector<1x1x256xf32> to vector<1x256xf32>
    %398 = vector.broadcast %395 : f32 to vector<1x256xf32>
    %399 = arith.mulf %398, %397 : vector<1x256xf32>
    %400 = arith.addf %394, %399 : vector<1x256xf32>
    %c87 = arith.constant 87 : index
    %401 = memref.load %arg2[%c87] : memref<98xf32, #tpu.memory_space<smem>>
    %c1_188 = arith.constant 1 : index
    %c0_189 = arith.constant 0 : index
    %c83_190 = arith.constant 83 : index
    %402 = vector.load %arg5[%c1_188, %c0_189, %c83_190] : memref<2x1x358xf32, #tpu.memory_space<vmem>>, vector<1x1x256xf32>
    %403 = vector.shape_cast %402 : vector<1x1x256xf32> to vector<1x256xf32>
    %404 = vector.broadcast %401 : f32 to vector<1x256xf32>
    %405 = arith.mulf %404, %403 : vector<1x256xf32>
    %406 = arith.addf %400, %405 : vector<1x256xf32>
    %c94 = arith.constant 94 : index
    %407 = memref.load %arg2[%c94] : memref<98xf32, #tpu.memory_space<smem>>
    %c1_191 = arith.constant 1 : index
    %c0_192 = arith.constant 0 : index
    %c99_193 = arith.constant 99 : index
    %408 = vector.load %arg5[%c1_191, %c0_192, %c99_193] : memref<2x1x358xf32, #tpu.memory_space<vmem>>, vector<1x1x256xf32>
    %409 = vector.shape_cast %408 : vector<1x1x256xf32> to vector<1x256xf32>
    %410 = vector.broadcast %407 : f32 to vector<1x256xf32>
    %411 = arith.mulf %410, %409 : vector<1x256xf32>
    %412 = arith.addf %406, %411 : vector<1x256xf32>
    %413 = arith.addf %327, %412 : vector<1x256xf32>
    %cst_194 = arith.constant 0.000000e+00 : f32
    %414 = vector.broadcast %cst_194 : f32 to vector<1x256xf32>
    %c4 = arith.constant 4 : index
    %415 = memref.load %arg2[%c4] : memref<98xf32, #tpu.memory_space<smem>>
    %c0_195 = arith.constant 0 : index
    %c0_196 = arith.constant 0 : index
    %c4_197 = arith.constant 4 : index
    %416 = vector.load %arg5[%c0_195, %c0_196, %c4_197] : memref<2x1x358xf32, #tpu.memory_space<vmem>>, vector<1x1x256xf32>
    %417 = vector.shape_cast %416 : vector<1x1x256xf32> to vector<1x256xf32>
    %418 = vector.broadcast %415 : f32 to vector<1x256xf32>
    %419 = arith.mulf %418, %417 : vector<1x256xf32>
    %420 = arith.addf %414, %419 : vector<1x256xf32>
    %c11 = arith.constant 11 : index
    %421 = memref.load %arg2[%c11] : memref<98xf32, #tpu.memory_space<smem>>
    %c0_198 = arith.constant 0 : index
    %c0_199 = arith.constant 0 : index
    %c20 = arith.constant 20 : index
    %422 = vector.load %arg5[%c0_198, %c0_199, %c20] : memref<2x1x358xf32, #tpu.memory_space<vmem>>, vector<1x1x256xf32>
    %423 = vector.shape_cast %422 : vector<1x1x256xf32> to vector<1x256xf32>
    %424 = vector.broadcast %421 : f32 to vector<1x256xf32>
    %425 = arith.mulf %424, %423 : vector<1x256xf32>
    %426 = arith.addf %420, %425 : vector<1x256xf32>
    %c18_200 = arith.constant 18 : index
    %427 = memref.load %arg2[%c18_200] : memref<98xf32, #tpu.memory_space<smem>>
    %c0_201 = arith.constant 0 : index
    %c0_202 = arith.constant 0 : index
    %c36_203 = arith.constant 36 : index
    %428 = vector.load %arg5[%c0_201, %c0_202, %c36_203] : memref<2x1x358xf32, #tpu.memory_space<vmem>>, vector<1x1x256xf32>
    %429 = vector.shape_cast %428 : vector<1x1x256xf32> to vector<1x256xf32>
    %430 = vector.broadcast %427 : f32 to vector<1x256xf32>
    %431 = arith.mulf %430, %429 : vector<1x256xf32>
    %432 = arith.addf %426, %431 : vector<1x256xf32>
    %c25 = arith.constant 25 : index
    %433 = memref.load %arg2[%c25] : memref<98xf32, #tpu.memory_space<smem>>
    %c0_204 = arith.constant 0 : index
    %c0_205 = arith.constant 0 : index
    %c52_206 = arith.constant 52 : index
    %434 = vector.load %arg5[%c0_204, %c0_205, %c52_206] : memref<2x1x358xf32, #tpu.memory_space<vmem>>, vector<1x1x256xf32>
    %435 = vector.shape_cast %434 : vector<1x1x256xf32> to vector<1x256xf32>
    %436 = vector.broadcast %433 : f32 to vector<1x256xf32>
    %437 = arith.mulf %436, %435 : vector<1x256xf32>
    %438 = arith.addf %432, %437 : vector<1x256xf32>
    %c32_207 = arith.constant 32 : index
    %439 = memref.load %arg2[%c32_207] : memref<98xf32, #tpu.memory_space<smem>>
    %c0_208 = arith.constant 0 : index
    %c0_209 = arith.constant 0 : index
    %c68 = arith.constant 68 : index
    %440 = vector.load %arg5[%c0_208, %c0_209, %c68] : memref<2x1x358xf32, #tpu.memory_space<vmem>>, vector<1x1x256xf32>
    %441 = vector.shape_cast %440 : vector<1x1x256xf32> to vector<1x256xf32>
    %442 = vector.broadcast %439 : f32 to vector<1x256xf32>
    %443 = arith.mulf %442, %441 : vector<1x256xf32>
    %444 = arith.addf %438, %443 : vector<1x256xf32>
    %c39 = arith.constant 39 : index
    %445 = memref.load %arg2[%c39] : memref<98xf32, #tpu.memory_space<smem>>
    %c0_210 = arith.constant 0 : index
    %c0_211 = arith.constant 0 : index
    %c84_212 = arith.constant 84 : index
    %446 = vector.load %arg5[%c0_210, %c0_211, %c84_212] : memref<2x1x358xf32, #tpu.memory_space<vmem>>, vector<1x1x256xf32>
    %447 = vector.shape_cast %446 : vector<1x1x256xf32> to vector<1x256xf32>
    %448 = vector.broadcast %445 : f32 to vector<1x256xf32>
    %449 = arith.mulf %448, %447 : vector<1x256xf32>
    %450 = arith.addf %444, %449 : vector<1x256xf32>
    %c46 = arith.constant 46 : index
    %451 = memref.load %arg2[%c46] : memref<98xf32, #tpu.memory_space<smem>>
    %c0_213 = arith.constant 0 : index
    %c0_214 = arith.constant 0 : index
    %c100 = arith.constant 100 : index
    %452 = vector.load %arg5[%c0_213, %c0_214, %c100] : memref<2x1x358xf32, #tpu.memory_space<vmem>>, vector<1x1x256xf32>
    %453 = vector.shape_cast %452 : vector<1x1x256xf32> to vector<1x256xf32>
    %454 = vector.broadcast %451 : f32 to vector<1x256xf32>
    %455 = arith.mulf %454, %453 : vector<1x256xf32>
    %456 = arith.addf %450, %455 : vector<1x256xf32>
    %c53 = arith.constant 53 : index
    %457 = memref.load %arg2[%c53] : memref<98xf32, #tpu.memory_space<smem>>
    %c1_215 = arith.constant 1 : index
    %c0_216 = arith.constant 0 : index
    %c4_217 = arith.constant 4 : index
    %458 = vector.load %arg5[%c1_215, %c0_216, %c4_217] : memref<2x1x358xf32, #tpu.memory_space<vmem>>, vector<1x1x256xf32>
    %459 = vector.shape_cast %458 : vector<1x1x256xf32> to vector<1x256xf32>
    %460 = vector.broadcast %457 : f32 to vector<1x256xf32>
    %461 = arith.mulf %460, %459 : vector<1x256xf32>
    %462 = arith.addf %456, %461 : vector<1x256xf32>
    %c60 = arith.constant 60 : index
    %463 = memref.load %arg2[%c60] : memref<98xf32, #tpu.memory_space<smem>>
    %c1_218 = arith.constant 1 : index
    %c0_219 = arith.constant 0 : index
    %c20_220 = arith.constant 20 : index
    %464 = vector.load %arg5[%c1_218, %c0_219, %c20_220] : memref<2x1x358xf32, #tpu.memory_space<vmem>>, vector<1x1x256xf32>
    %465 = vector.shape_cast %464 : vector<1x1x256xf32> to vector<1x256xf32>
    %466 = vector.broadcast %463 : f32 to vector<1x256xf32>
    %467 = arith.mulf %466, %465 : vector<1x256xf32>
    %468 = arith.addf %462, %467 : vector<1x256xf32>
    %c67_221 = arith.constant 67 : index
    %469 = memref.load %arg2[%c67_221] : memref<98xf32, #tpu.memory_space<smem>>
    %c1_222 = arith.constant 1 : index
    %c0_223 = arith.constant 0 : index
    %c36_224 = arith.constant 36 : index
    %470 = vector.load %arg5[%c1_222, %c0_223, %c36_224] : memref<2x1x358xf32, #tpu.memory_space<vmem>>, vector<1x1x256xf32>
    %471 = vector.shape_cast %470 : vector<1x1x256xf32> to vector<1x256xf32>
    %472 = vector.broadcast %469 : f32 to vector<1x256xf32>
    %473 = arith.mulf %472, %471 : vector<1x256xf32>
    %474 = arith.addf %468, %473 : vector<1x256xf32>
    %c74 = arith.constant 74 : index
    %475 = memref.load %arg2[%c74] : memref<98xf32, #tpu.memory_space<smem>>
    %c1_225 = arith.constant 1 : index
    %c0_226 = arith.constant 0 : index
    %c52_227 = arith.constant 52 : index
    %476 = vector.load %arg5[%c1_225, %c0_226, %c52_227] : memref<2x1x358xf32, #tpu.memory_space<vmem>>, vector<1x1x256xf32>
    %477 = vector.shape_cast %476 : vector<1x1x256xf32> to vector<1x256xf32>
    %478 = vector.broadcast %475 : f32 to vector<1x256xf32>
    %479 = arith.mulf %478, %477 : vector<1x256xf32>
    %480 = arith.addf %474, %479 : vector<1x256xf32>
    %c81_228 = arith.constant 81 : index
    %481 = memref.load %arg2[%c81_228] : memref<98xf32, #tpu.memory_space<smem>>
    %c1_229 = arith.constant 1 : index
    %c0_230 = arith.constant 0 : index
    %c68_231 = arith.constant 68 : index
    %482 = vector.load %arg5[%c1_229, %c0_230, %c68_231] : memref<2x1x358xf32, #tpu.memory_space<vmem>>, vector<1x1x256xf32>
    %483 = vector.shape_cast %482 : vector<1x1x256xf32> to vector<1x256xf32>
    %484 = vector.broadcast %481 : f32 to vector<1x256xf32>
    %485 = arith.mulf %484, %483 : vector<1x256xf32>
    %486 = arith.addf %480, %485 : vector<1x256xf32>
    %c88 = arith.constant 88 : index
    %487 = memref.load %arg2[%c88] : memref<98xf32, #tpu.memory_space<smem>>
    %c1_232 = arith.constant 1 : index
    %c0_233 = arith.constant 0 : index
    %c84_234 = arith.constant 84 : index
    %488 = vector.load %arg5[%c1_232, %c0_233, %c84_234] : memref<2x1x358xf32, #tpu.memory_space<vmem>>, vector<1x1x256xf32>
    %489 = vector.shape_cast %488 : vector<1x1x256xf32> to vector<1x256xf32>
    %490 = vector.broadcast %487 : f32 to vector<1x256xf32>
    %491 = arith.mulf %490, %489 : vector<1x256xf32>
    %492 = arith.addf %486, %491 : vector<1x256xf32>
    %c95 = arith.constant 95 : index
    %493 = memref.load %arg2[%c95] : memref<98xf32, #tpu.memory_space<smem>>
    %c1_235 = arith.constant 1 : index
    %c0_236 = arith.constant 0 : index
    %c100_237 = arith.constant 100 : index
    %494 = vector.load %arg5[%c1_235, %c0_236, %c100_237] : memref<2x1x358xf32, #tpu.memory_space<vmem>>, vector<1x1x256xf32>
    %495 = vector.shape_cast %494 : vector<1x1x256xf32> to vector<1x256xf32>
    %496 = vector.broadcast %493 : f32 to vector<1x256xf32>
    %497 = arith.mulf %496, %495 : vector<1x256xf32>
    %498 = arith.addf %492, %497 : vector<1x256xf32>
    %c0_i32_238 = arith.constant 0 : i32
    %499 = vector.broadcast %c0_i32_238 : i32 to vector<1x256xi32>
    %500 = arith.cmpi sge, %47, %499 : vector<1x256xi32>
    %c15_i32 = arith.constant 15 : i32
    %501 = vector.broadcast %c15_i32 : i32 to vector<1x256xi32>
    %502 = arith.cmpi slt, %47, %501 : vector<1x256xi32>
    %503 = arith.andi %500, %502 : vector<1x256xi1>
    %cst_239 = arith.constant 0.000000e+00 : f32
    %504 = vector.broadcast %cst_239 : f32 to vector<1x256xf32>
    %505 = arith.select %503, %498, %504 : vector<1x256xi1>, vector<1x256xf32>
    %506 = arith.addf %413, %505 : vector<1x256xf32>
    %cst_240 = arith.constant 0.000000e+00 : f32
    %507 = vector.broadcast %cst_240 : f32 to vector<1x256xf32>
    %c5 = arith.constant 5 : index
    %508 = memref.load %arg2[%c5] : memref<98xf32, #tpu.memory_space<smem>>
    %c0_241 = arith.constant 0 : index
    %c0_242 = arith.constant 0 : index
    %c5_243 = arith.constant 5 : index
    %509 = vector.load %arg5[%c0_241, %c0_242, %c5_243] : memref<2x1x358xf32, #tpu.memory_space<vmem>>, vector<1x1x256xf32>
    %510 = vector.shape_cast %509 : vector<1x1x256xf32> to vector<1x256xf32>
    %511 = vector.broadcast %508 : f32 to vector<1x256xf32>
    %512 = arith.mulf %511, %510 : vector<1x256xf32>
    %513 = arith.addf %507, %512 : vector<1x256xf32>
    %c12 = arith.constant 12 : index
    %514 = memref.load %arg2[%c12] : memref<98xf32, #tpu.memory_space<smem>>
    %c0_244 = arith.constant 0 : index
    %c0_245 = arith.constant 0 : index
    %c21_246 = arith.constant 21 : index
    %515 = vector.load %arg5[%c0_244, %c0_245, %c21_246] : memref<2x1x358xf32, #tpu.memory_space<vmem>>, vector<1x1x256xf32>
    %516 = vector.shape_cast %515 : vector<1x1x256xf32> to vector<1x256xf32>
    %517 = vector.broadcast %514 : f32 to vector<1x256xf32>
    %518 = arith.mulf %517, %516 : vector<1x256xf32>
    %519 = arith.addf %513, %518 : vector<1x256xf32>
    %c19_247 = arith.constant 19 : index
    %520 = memref.load %arg2[%c19_247] : memref<98xf32, #tpu.memory_space<smem>>
    %c0_248 = arith.constant 0 : index
    %c0_249 = arith.constant 0 : index
    %c37_250 = arith.constant 37 : index
    %521 = vector.load %arg5[%c0_248, %c0_249, %c37_250] : memref<2x1x358xf32, #tpu.memory_space<vmem>>, vector<1x1x256xf32>
    %522 = vector.shape_cast %521 : vector<1x1x256xf32> to vector<1x256xf32>
    %523 = vector.broadcast %520 : f32 to vector<1x256xf32>
    %524 = arith.mulf %523, %522 : vector<1x256xf32>
    %525 = arith.addf %519, %524 : vector<1x256xf32>
    %c26 = arith.constant 26 : index
    %526 = memref.load %arg2[%c26] : memref<98xf32, #tpu.memory_space<smem>>
    %c0_251 = arith.constant 0 : index
    %c0_252 = arith.constant 0 : index
    %c53_253 = arith.constant 53 : index
    %527 = vector.load %arg5[%c0_251, %c0_252, %c53_253] : memref<2x1x358xf32, #tpu.memory_space<vmem>>, vector<1x1x256xf32>
    %528 = vector.shape_cast %527 : vector<1x1x256xf32> to vector<1x256xf32>
    %529 = vector.broadcast %526 : f32 to vector<1x256xf32>
    %530 = arith.mulf %529, %528 : vector<1x256xf32>
    %531 = arith.addf %525, %530 : vector<1x256xf32>
    %c33_254 = arith.constant 33 : index
    %532 = memref.load %arg2[%c33_254] : memref<98xf32, #tpu.memory_space<smem>>
    %c0_255 = arith.constant 0 : index
    %c0_256 = arith.constant 0 : index
    %c69 = arith.constant 69 : index
    %533 = vector.load %arg5[%c0_255, %c0_256, %c69] : memref<2x1x358xf32, #tpu.memory_space<vmem>>, vector<1x1x256xf32>
    %534 = vector.shape_cast %533 : vector<1x1x256xf32> to vector<1x256xf32>
    %535 = vector.broadcast %532 : f32 to vector<1x256xf32>
    %536 = arith.mulf %535, %534 : vector<1x256xf32>
    %537 = arith.addf %531, %536 : vector<1x256xf32>
    %c40 = arith.constant 40 : index
    %538 = memref.load %arg2[%c40] : memref<98xf32, #tpu.memory_space<smem>>
    %c0_257 = arith.constant 0 : index
    %c0_258 = arith.constant 0 : index
    %c85_259 = arith.constant 85 : index
    %539 = vector.load %arg5[%c0_257, %c0_258, %c85_259] : memref<2x1x358xf32, #tpu.memory_space<vmem>>, vector<1x1x256xf32>
    %540 = vector.shape_cast %539 : vector<1x1x256xf32> to vector<1x256xf32>
    %541 = vector.broadcast %538 : f32 to vector<1x256xf32>
    %542 = arith.mulf %541, %540 : vector<1x256xf32>
    %543 = arith.addf %537, %542 : vector<1x256xf32>
    %c47 = arith.constant 47 : index
    %544 = memref.load %arg2[%c47] : memref<98xf32, #tpu.memory_space<smem>>
    %c0_260 = arith.constant 0 : index
    %c0_261 = arith.constant 0 : index
    %c101 = arith.constant 101 : index
    %545 = vector.load %arg5[%c0_260, %c0_261, %c101] : memref<2x1x358xf32, #tpu.memory_space<vmem>>, vector<1x1x256xf32>
    %546 = vector.shape_cast %545 : vector<1x1x256xf32> to vector<1x256xf32>
    %547 = vector.broadcast %544 : f32 to vector<1x256xf32>
    %548 = arith.mulf %547, %546 : vector<1x256xf32>
    %549 = arith.addf %543, %548 : vector<1x256xf32>
    %c54 = arith.constant 54 : index
    %550 = memref.load %arg2[%c54] : memref<98xf32, #tpu.memory_space<smem>>
    %c1_262 = arith.constant 1 : index
    %c0_263 = arith.constant 0 : index
    %c5_264 = arith.constant 5 : index
    %551 = vector.load %arg5[%c1_262, %c0_263, %c5_264] : memref<2x1x358xf32, #tpu.memory_space<vmem>>, vector<1x1x256xf32>
    %552 = vector.shape_cast %551 : vector<1x1x256xf32> to vector<1x256xf32>
    %553 = vector.broadcast %550 : f32 to vector<1x256xf32>
    %554 = arith.mulf %553, %552 : vector<1x256xf32>
    %555 = arith.addf %549, %554 : vector<1x256xf32>
    %c61 = arith.constant 61 : index
    %556 = memref.load %arg2[%c61] : memref<98xf32, #tpu.memory_space<smem>>
    %c1_265 = arith.constant 1 : index
    %c0_266 = arith.constant 0 : index
    %c21_267 = arith.constant 21 : index
    %557 = vector.load %arg5[%c1_265, %c0_266, %c21_267] : memref<2x1x358xf32, #tpu.memory_space<vmem>>, vector<1x1x256xf32>
    %558 = vector.shape_cast %557 : vector<1x1x256xf32> to vector<1x256xf32>
    %559 = vector.broadcast %556 : f32 to vector<1x256xf32>
    %560 = arith.mulf %559, %558 : vector<1x256xf32>
    %561 = arith.addf %555, %560 : vector<1x256xf32>
    %c68_268 = arith.constant 68 : index
    %562 = memref.load %arg2[%c68_268] : memref<98xf32, #tpu.memory_space<smem>>
    %c1_269 = arith.constant 1 : index
    %c0_270 = arith.constant 0 : index
    %c37_271 = arith.constant 37 : index
    %563 = vector.load %arg5[%c1_269, %c0_270, %c37_271] : memref<2x1x358xf32, #tpu.memory_space<vmem>>, vector<1x1x256xf32>
    %564 = vector.shape_cast %563 : vector<1x1x256xf32> to vector<1x256xf32>
    %565 = vector.broadcast %562 : f32 to vector<1x256xf32>
    %566 = arith.mulf %565, %564 : vector<1x256xf32>
    %567 = arith.addf %561, %566 : vector<1x256xf32>
    %c75 = arith.constant 75 : index
    %568 = memref.load %arg2[%c75] : memref<98xf32, #tpu.memory_space<smem>>
    %c1_272 = arith.constant 1 : index
    %c0_273 = arith.constant 0 : index
    %c53_274 = arith.constant 53 : index
    %569 = vector.load %arg5[%c1_272, %c0_273, %c53_274] : memref<2x1x358xf32, #tpu.memory_space<vmem>>, vector<1x1x256xf32>
    %570 = vector.shape_cast %569 : vector<1x1x256xf32> to vector<1x256xf32>
    %571 = vector.broadcast %568 : f32 to vector<1x256xf32>
    %572 = arith.mulf %571, %570 : vector<1x256xf32>
    %573 = arith.addf %567, %572 : vector<1x256xf32>
    %c82_275 = arith.constant 82 : index
    %574 = memref.load %arg2[%c82_275] : memref<98xf32, #tpu.memory_space<smem>>
    %c1_276 = arith.constant 1 : index
    %c0_277 = arith.constant 0 : index
    %c69_278 = arith.constant 69 : index
    %575 = vector.load %arg5[%c1_276, %c0_277, %c69_278] : memref<2x1x358xf32, #tpu.memory_space<vmem>>, vector<1x1x256xf32>
    %576 = vector.shape_cast %575 : vector<1x1x256xf32> to vector<1x256xf32>
    %577 = vector.broadcast %574 : f32 to vector<1x256xf32>
    %578 = arith.mulf %577, %576 : vector<1x256xf32>
    %579 = arith.addf %573, %578 : vector<1x256xf32>
    %c89 = arith.constant 89 : index
    %580 = memref.load %arg2[%c89] : memref<98xf32, #tpu.memory_space<smem>>
    %c1_279 = arith.constant 1 : index
    %c0_280 = arith.constant 0 : index
    %c85_281 = arith.constant 85 : index
    %581 = vector.load %arg5[%c1_279, %c0_280, %c85_281] : memref<2x1x358xf32, #tpu.memory_space<vmem>>, vector<1x1x256xf32>
    %582 = vector.shape_cast %581 : vector<1x1x256xf32> to vector<1x256xf32>
    %583 = vector.broadcast %580 : f32 to vector<1x256xf32>
    %584 = arith.mulf %583, %582 : vector<1x256xf32>
    %585 = arith.addf %579, %584 : vector<1x256xf32>
    %c96_282 = arith.constant 96 : index
    %586 = memref.load %arg2[%c96_282] : memref<98xf32, #tpu.memory_space<smem>>
    %c1_283 = arith.constant 1 : index
    %c0_284 = arith.constant 0 : index
    %c101_285 = arith.constant 101 : index
    %587 = vector.load %arg5[%c1_283, %c0_284, %c101_285] : memref<2x1x358xf32, #tpu.memory_space<vmem>>, vector<1x1x256xf32>
    %588 = vector.shape_cast %587 : vector<1x1x256xf32> to vector<1x256xf32>
    %589 = vector.broadcast %586 : f32 to vector<1x256xf32>
    %590 = arith.mulf %589, %588 : vector<1x256xf32>
    %591 = arith.addf %585, %590 : vector<1x256xf32>
    %c0_i32_286 = arith.constant 0 : i32
    %592 = vector.broadcast %c0_i32_286 : i32 to vector<1x256xi32>
    %593 = arith.cmpi sge, %47, %592 : vector<1x256xi32>
    %c14_i32 = arith.constant 14 : i32
    %594 = vector.broadcast %c14_i32 : i32 to vector<1x256xi32>
    %595 = arith.cmpi slt, %47, %594 : vector<1x256xi32>
    %596 = arith.andi %593, %595 : vector<1x256xi1>
    %cst_287 = arith.constant 0.000000e+00 : f32
    %597 = vector.broadcast %cst_287 : f32 to vector<1x256xf32>
    %598 = arith.select %596, %591, %597 : vector<1x256xi1>, vector<1x256xf32>
    %599 = arith.addf %506, %598 : vector<1x256xf32>
    %cst_288 = arith.constant 0.000000e+00 : f32
    %600 = vector.broadcast %cst_288 : f32 to vector<1x256xf32>
    %c6 = arith.constant 6 : index
    %601 = memref.load %arg2[%c6] : memref<98xf32, #tpu.memory_space<smem>>
    %c0_289 = arith.constant 0 : index
    %c0_290 = arith.constant 0 : index
    %c6_291 = arith.constant 6 : index
    %602 = vector.load %arg5[%c0_289, %c0_290, %c6_291] : memref<2x1x358xf32, #tpu.memory_space<vmem>>, vector<1x1x256xf32>
    %603 = vector.shape_cast %602 : vector<1x1x256xf32> to vector<1x256xf32>
    %604 = vector.broadcast %601 : f32 to vector<1x256xf32>
    %605 = arith.mulf %604, %603 : vector<1x256xf32>
    %606 = arith.addf %600, %605 : vector<1x256xf32>
    %c13 = arith.constant 13 : index
    %607 = memref.load %arg2[%c13] : memref<98xf32, #tpu.memory_space<smem>>
    %c0_292 = arith.constant 0 : index
    %c0_293 = arith.constant 0 : index
    %c22_294 = arith.constant 22 : index
    %608 = vector.load %arg5[%c0_292, %c0_293, %c22_294] : memref<2x1x358xf32, #tpu.memory_space<vmem>>, vector<1x1x256xf32>
    %609 = vector.shape_cast %608 : vector<1x1x256xf32> to vector<1x256xf32>
    %610 = vector.broadcast %607 : f32 to vector<1x256xf32>
    %611 = arith.mulf %610, %609 : vector<1x256xf32>
    %612 = arith.addf %606, %611 : vector<1x256xf32>
    %c20_295 = arith.constant 20 : index
    %613 = memref.load %arg2[%c20_295] : memref<98xf32, #tpu.memory_space<smem>>
    %c0_296 = arith.constant 0 : index
    %c0_297 = arith.constant 0 : index
    %c38_298 = arith.constant 38 : index
    %614 = vector.load %arg5[%c0_296, %c0_297, %c38_298] : memref<2x1x358xf32, #tpu.memory_space<vmem>>, vector<1x1x256xf32>
    %615 = vector.shape_cast %614 : vector<1x1x256xf32> to vector<1x256xf32>
    %616 = vector.broadcast %613 : f32 to vector<1x256xf32>
    %617 = arith.mulf %616, %615 : vector<1x256xf32>
    %618 = arith.addf %612, %617 : vector<1x256xf32>
    %c27 = arith.constant 27 : index
    %619 = memref.load %arg2[%c27] : memref<98xf32, #tpu.memory_space<smem>>
    %c0_299 = arith.constant 0 : index
    %c0_300 = arith.constant 0 : index
    %c54_301 = arith.constant 54 : index
    %620 = vector.load %arg5[%c0_299, %c0_300, %c54_301] : memref<2x1x358xf32, #tpu.memory_space<vmem>>, vector<1x1x256xf32>
    %621 = vector.shape_cast %620 : vector<1x1x256xf32> to vector<1x256xf32>
    %622 = vector.broadcast %619 : f32 to vector<1x256xf32>
    %623 = arith.mulf %622, %621 : vector<1x256xf32>
    %624 = arith.addf %618, %623 : vector<1x256xf32>
    %c34_302 = arith.constant 34 : index
    %625 = memref.load %arg2[%c34_302] : memref<98xf32, #tpu.memory_space<smem>>
    %c0_303 = arith.constant 0 : index
    %c0_304 = arith.constant 0 : index
    %c70_305 = arith.constant 70 : index
    %626 = vector.load %arg5[%c0_303, %c0_304, %c70_305] : memref<2x1x358xf32, #tpu.memory_space<vmem>>, vector<1x1x256xf32>
    %627 = vector.shape_cast %626 : vector<1x1x256xf32> to vector<1x256xf32>
    %628 = vector.broadcast %625 : f32 to vector<1x256xf32>
    %629 = arith.mulf %628, %627 : vector<1x256xf32>
    %630 = arith.addf %624, %629 : vector<1x256xf32>
    %c41 = arith.constant 41 : index
    %631 = memref.load %arg2[%c41] : memref<98xf32, #tpu.memory_space<smem>>
    %c0_306 = arith.constant 0 : index
    %c0_307 = arith.constant 0 : index
    %c86_308 = arith.constant 86 : index
    %632 = vector.load %arg5[%c0_306, %c0_307, %c86_308] : memref<2x1x358xf32, #tpu.memory_space<vmem>>, vector<1x1x256xf32>
    %633 = vector.shape_cast %632 : vector<1x1x256xf32> to vector<1x256xf32>
    %634 = vector.broadcast %631 : f32 to vector<1x256xf32>
    %635 = arith.mulf %634, %633 : vector<1x256xf32>
    %636 = arith.addf %630, %635 : vector<1x256xf32>
    %c48_309 = arith.constant 48 : index
    %637 = memref.load %arg2[%c48_309] : memref<98xf32, #tpu.memory_space<smem>>
    %c0_310 = arith.constant 0 : index
    %c0_311 = arith.constant 0 : index
    %c102 = arith.constant 102 : index
    %638 = vector.load %arg5[%c0_310, %c0_311, %c102] : memref<2x1x358xf32, #tpu.memory_space<vmem>>, vector<1x1x256xf32>
    %639 = vector.shape_cast %638 : vector<1x1x256xf32> to vector<1x256xf32>
    %640 = vector.broadcast %637 : f32 to vector<1x256xf32>
    %641 = arith.mulf %640, %639 : vector<1x256xf32>
    %642 = arith.addf %636, %641 : vector<1x256xf32>
    %c55 = arith.constant 55 : index
    %643 = memref.load %arg2[%c55] : memref<98xf32, #tpu.memory_space<smem>>
    %c1_312 = arith.constant 1 : index
    %c0_313 = arith.constant 0 : index
    %c6_314 = arith.constant 6 : index
    %644 = vector.load %arg5[%c1_312, %c0_313, %c6_314] : memref<2x1x358xf32, #tpu.memory_space<vmem>>, vector<1x1x256xf32>
    %645 = vector.shape_cast %644 : vector<1x1x256xf32> to vector<1x256xf32>
    %646 = vector.broadcast %643 : f32 to vector<1x256xf32>
    %647 = arith.mulf %646, %645 : vector<1x256xf32>
    %648 = arith.addf %642, %647 : vector<1x256xf32>
    %c62 = arith.constant 62 : index
    %649 = memref.load %arg2[%c62] : memref<98xf32, #tpu.memory_space<smem>>
    %c1_315 = arith.constant 1 : index
    %c0_316 = arith.constant 0 : index
    %c22_317 = arith.constant 22 : index
    %650 = vector.load %arg5[%c1_315, %c0_316, %c22_317] : memref<2x1x358xf32, #tpu.memory_space<vmem>>, vector<1x1x256xf32>
    %651 = vector.shape_cast %650 : vector<1x1x256xf32> to vector<1x256xf32>
    %652 = vector.broadcast %649 : f32 to vector<1x256xf32>
    %653 = arith.mulf %652, %651 : vector<1x256xf32>
    %654 = arith.addf %648, %653 : vector<1x256xf32>
    %c69_318 = arith.constant 69 : index
    %655 = memref.load %arg2[%c69_318] : memref<98xf32, #tpu.memory_space<smem>>
    %c1_319 = arith.constant 1 : index
    %c0_320 = arith.constant 0 : index
    %c38_321 = arith.constant 38 : index
    %656 = vector.load %arg5[%c1_319, %c0_320, %c38_321] : memref<2x1x358xf32, #tpu.memory_space<vmem>>, vector<1x1x256xf32>
    %657 = vector.shape_cast %656 : vector<1x1x256xf32> to vector<1x256xf32>
    %658 = vector.broadcast %655 : f32 to vector<1x256xf32>
    %659 = arith.mulf %658, %657 : vector<1x256xf32>
    %660 = arith.addf %654, %659 : vector<1x256xf32>
    %c76 = arith.constant 76 : index
    %661 = memref.load %arg2[%c76] : memref<98xf32, #tpu.memory_space<smem>>
    %c1_322 = arith.constant 1 : index
    %c0_323 = arith.constant 0 : index
    %c54_324 = arith.constant 54 : index
    %662 = vector.load %arg5[%c1_322, %c0_323, %c54_324] : memref<2x1x358xf32, #tpu.memory_space<vmem>>, vector<1x1x256xf32>
    %663 = vector.shape_cast %662 : vector<1x1x256xf32> to vector<1x256xf32>
    %664 = vector.broadcast %661 : f32 to vector<1x256xf32>
    %665 = arith.mulf %664, %663 : vector<1x256xf32>
    %666 = arith.addf %660, %665 : vector<1x256xf32>
    %c83_325 = arith.constant 83 : index
    %667 = memref.load %arg2[%c83_325] : memref<98xf32, #tpu.memory_space<smem>>
    %c1_326 = arith.constant 1 : index
    %c0_327 = arith.constant 0 : index
    %c70_328 = arith.constant 70 : index
    %668 = vector.load %arg5[%c1_326, %c0_327, %c70_328] : memref<2x1x358xf32, #tpu.memory_space<vmem>>, vector<1x1x256xf32>
    %669 = vector.shape_cast %668 : vector<1x1x256xf32> to vector<1x256xf32>
    %670 = vector.broadcast %667 : f32 to vector<1x256xf32>
    %671 = arith.mulf %670, %669 : vector<1x256xf32>
    %672 = arith.addf %666, %671 : vector<1x256xf32>
    %c90 = arith.constant 90 : index
    %673 = memref.load %arg2[%c90] : memref<98xf32, #tpu.memory_space<smem>>
    %c1_329 = arith.constant 1 : index
    %c0_330 = arith.constant 0 : index
    %c86_331 = arith.constant 86 : index
    %674 = vector.load %arg5[%c1_329, %c0_330, %c86_331] : memref<2x1x358xf32, #tpu.memory_space<vmem>>, vector<1x1x256xf32>
    %675 = vector.shape_cast %674 : vector<1x1x256xf32> to vector<1x256xf32>
    %676 = vector.broadcast %673 : f32 to vector<1x256xf32>
    %677 = arith.mulf %676, %675 : vector<1x256xf32>
    %678 = arith.addf %672, %677 : vector<1x256xf32>
    %c97_332 = arith.constant 97 : index
    %679 = memref.load %arg2[%c97_332] : memref<98xf32, #tpu.memory_space<smem>>
    %c1_333 = arith.constant 1 : index
    %c0_334 = arith.constant 0 : index
    %c102_335 = arith.constant 102 : index
    %680 = vector.load %arg5[%c1_333, %c0_334, %c102_335] : memref<2x1x358xf32, #tpu.memory_space<vmem>>, vector<1x1x256xf32>
    %681 = vector.shape_cast %680 : vector<1x1x256xf32> to vector<1x256xf32>
    %682 = vector.broadcast %679 : f32 to vector<1x256xf32>
    %683 = arith.mulf %682, %681 : vector<1x256xf32>
    %684 = arith.addf %678, %683 : vector<1x256xf32>
    %c0_i32_336 = arith.constant 0 : i32
    %685 = vector.broadcast %c0_i32_336 : i32 to vector<1x256xi32>
    %686 = arith.cmpi sge, %47, %685 : vector<1x256xi32>
    %c13_i32 = arith.constant 13 : i32
    %687 = vector.broadcast %c13_i32 : i32 to vector<1x256xi32>
    %688 = arith.cmpi slt, %47, %687 : vector<1x256xi32>
    %689 = arith.andi %686, %688 : vector<1x256xi1>
    %cst_337 = arith.constant 0.000000e+00 : f32
    %690 = vector.broadcast %cst_337 : f32 to vector<1x256xf32>
    %691 = arith.select %689, %684, %690 : vector<1x256xi1>, vector<1x256xf32>
    %692 = arith.addf %599, %691 : vector<1x256xf32>
    %c0_338 = arith.constant 0 : index
    %693 = memref.load %arg3[%c0_338] : memref<2xf32, #tpu.memory_space<smem>>
    %694 = vector.broadcast %693 : f32 to vector<1x256xf32>
    %695 = arith.mulf %692, %694 : vector<1x256xf32>
    %c1_339 = arith.constant 1 : index
    %696 = memref.load %arg3[%c1_339] : memref<2xf32, #tpu.memory_space<smem>>
    %697 = vector.broadcast %696 : f32 to vector<1x256xf32>
    %698 = arith.addf %695, %697 : vector<1x256xf32>
    %699 = arith.negf %698 : vector<1x256xf32>
    %700 = math.exp %699 : vector<1x256xf32>
    %cst_340 = arith.constant 1.000000e+00 : f32
    %701 = vector.broadcast %cst_340 : f32 to vector<1x256xf32>
    %702 = arith.addf %701, %700 : vector<1x256xf32>
    %703 = arith.divf %701, %702 : vector<1x256xf32>
    %c0_341 = arith.constant 0 : index
    %c0_342 = arith.constant 0 : index
    %c0_343 = arith.constant 0 : index
    %704 = vector.load %arg1[%c0_341, %c0_342, %c0_343] : memref<1x4x256xf32, #tpu.memory_space<vmem>>, vector<1x4x256xf32>
    %705 = vector.shape_cast %704 : vector<1x4x256xf32> to vector<4x256xf32>
    %706 = vector.broadcast %703 : vector<1x256xf32> to vector<4x256xf32>
    %707 = arith.mulf %705, %706 : vector<4x256xf32>
    %c0_344 = arith.constant 0 : index
    %c0_345 = arith.constant 0 : index
    %c0_346 = arith.constant 0 : index
    %708 = vector.load %arg4[%c0_344, %c0_345, %c0_346] : memref<1x4x256xf32, #tpu.memory_space<vmem>>, vector<1x4x256xf32>
    %709 = vector.shape_cast %708 : vector<1x4x256xf32> to vector<4x256xf32>
    %710 = vector.shape_cast %707 : vector<4x256xf32> to vector<1x4x256xf32>
    tpu.vector_store %arg4[%c0_344, %c0_345, %c0_346], %710 {strides = array<i32>} : memref<1x4x256xf32, #tpu.memory_space<vmem>>, vector<1x4x256xf32>,
    return
  }
  func.func @transform_0(%arg0: i32) -> (i32, i32, i32) {
    %c0_i32 = arith.constant 0 : i32
    %c0_i32_0 = arith.constant 0 : i32
    %c0_i32_1 = arith.constant 0 : i32
    return %arg0, %c0_i32, %c0_i32_0 : i32, i32, i32
  }
  func.func @transform_1(%arg0: i32) -> i32 {
    %c0_i32 = arith.constant 0 : i32
    %c0_i32_0 = arith.constant 0 : i32
    return %c0_i32 : i32
  }
  func.func @transform_2(%arg0: i32) -> i32 {
    %c0_i32 = arith.constant 0 : i32
    %c0_i32_0 = arith.constant 0 : i32
    return %c0_i32 : i32
  }
  func.func @transform_3(%arg0: i32) -> (i32, i32, i32) {
    %c0_i32 = arith.constant 0 : i32
    %c0_i32_0 = arith.constant 0 : i32
    %c0_i32_1 = arith.constant 0 : i32
    return %arg0, %c0_i32, %c0_i32_0 : i32, i32, i32
  }
}

</mosaic_0001>

<bundles_post_ra>
// kernel: tpu_custom_call.1
= control target key start
LH: loop header
LB: loop body
LE: loop exit
PB: predicated region body
PF: predicated region fallthrough
CT: control target
= control target key end

     0   :  { %8 = vsyncpa [#allocation4], 0  ;;  %s2674_s0 = inlined_call_operand.hbm [shape: f32[2,4,256], index: 0, kind: input, shape index: {}]   ;;  %s2675_s1 = inlined_call_operand.vmem [shape: f32[98], index: 1, kind: input, shape index: {}]   ;;  %s2676_s2 = inlined_call_operand.vmem [shape: f32[2], index: 2, kind: input, shape index: {}]   ;;  %s2677_s3 = inlined_call_operand.hbm [shape: f32[2,4,256], index: 3, kind: output, shape index: {}]  }
   0x1   :  { %10 = vsyncpa [#allocation4 + $0x1], 0 }
   0x2   :  { %11 = vsyncpa [#allocation6], 0 }
   0x3   :  { %12 = vsyncpa [#allocation9], 0 }
   0x4   :  { %13 = vsyncpa [#allocation5], 0 }
   0x5   :  { %15 = vsyncpa [#allocation5 + $0x1], 0  ;;  %s1984_s12 = smov 0   ;;  %s1986_s13 = smov 0  }
   0x6   :  { %s1988_s14 = smov 0   ;;  %s1990_s15 = smov 0  }
   0x7 LB: > { %s2005_s16 = sadd.s32 4294967295, %s1943_s15   ;;  %s1598_s17 = sadd.s32 4294967294, %s1943_s15   ;;  %s1943_s15 = sphi %s1990_s15, %s2701_s15   ;;  %s1939_s14 = sphi %s1988_s14, %s2700_s14   ;;  %s1935_s13 = sphi %s1986_s13, %s2699_s13   ;;  %s1931_s12 = sphi %s1984_s12, %s2698_s12  }
   0x8   : > { %p41_p0 = scmp.ne.s32.totalorder %s1935_s13, %s1931_s12  ;;  %p2678_p1 = scmp.eq.s32.totalorder %s2005_s16, 0 }
   0x9   : > { %p113_p3 = scmp.eq.s32.totalorder %s1598_s17, 1  ;;  %p1599_p5 = scmp.ge.s32.totalorder %s1943_s15, 1 }
   0xa   : > { %p2014_p4 = por %p2678_p1, %p41_p0  ;;  %p120_p7 = scmp.lt.s32.totalorder %s1943_s15, 3 }
   0xb   : > { %p2019_p6 = por %p113_p3, %p41_p0  ;;  %s133_s22 = sshll.u32 %s2675_s1, 4  ;;  %s134_s22 = int_to_ptr.vmem [resolvable:$true] %s133_s22 }
   0xc   : > { %s2681_s18 = scalar_select %p2014_p4, 1, 0 }
   0xd   : > { %s2682_s19 = scalar_select %p2019_p6, 1, 0 }
   0xe   : > { %p2027_p8 = pnand %p1599_p5, %p120_p7  ;;  %s144_s26 = sshll.u32 %s2676_s2, 4  ;;  %s145_s26 = int_to_ptr.vmem [resolvable:$true] %s144_s26 }
   0xf   : > { %s2044_s28 = sadd.s32 1, %s1943_s15   ;;  %s1809_s30 = scalar_lea.vmem %s134_s22, 16 }
  0x10   : > { %s2683_s23 = scalar_select %p2027_p8, 1, 0 }
  0x11   : > { %p1730_p10 = pneg %p2027_p8  ;;  %s25_s29 = ssub.s32 %s1943_s15, %s2044_s28 }
  0x12   : > { %p1810_p12 = scmp.ne.s32.totalorder %s134_s22, %s1809_s30  ;;  %p1817_p5 = scmp.lt.s32.totalorder %s134_s22, %s134_s22 }
  0x13   : > { %p2039_p11 = pnand %p1730_p10, %p2678_p1  ;;  %p1818_p7 = scmp.lt.s32.totalorder %s1809_s30, %s1809_s30 }
  0x15   : > { %p1811_p13 = pneg %p2039_p11  ;;  %p1819_p9 = por %p1818_p7, %p1817_p5 }
  0x17   : > { %p1812_p0 = pnand %p1811_p13, %p1810_p12 }
  0x19   : > { %p1813_p3 = pneg %p1812_p0 }
  0x1b   : > { %p1820_p2 = pnand %p1819_p9, %p1813_p3 }
  0x1d   : > { %1823 = shalt.err (!%p1820_p2)
}
  0x1e   : > { %s1945_s4 = smov [#allocation7]   ;;  %s1824_s5 = scalar_lea.vmem %s145_s26, 16 }
  0x1f   : > { %1733 = dma.vmem_to_smem (!%p2039_p11), %s134_s22, 16, %s1945_s4, [#allocation6]  }
  0x20   : > { %p1825_p10 = scmp.ne.s32.totalorder %s145_s26, %s1824_s5  ;;  %p1832_p4 = scmp.lt.s32.totalorder %s145_s26, %s145_s26 }
  0x21   : > { %p1833_p8 = scmp.lt.s32.totalorder %s1824_s5, %s1824_s5 }
  0x22   : > { %p1827_p1 = pnand %p1825_p10, %p1811_p13 }
  0x23   : > { %p1834_p12 = por %p1833_p8, %p1832_p4 }
  0x24   : > { %p1828_p6 = pneg %p1827_p1 }
  0x26   : > { %p1835_p0 = pnand %p1834_p12, %p1828_p6 }
  0x28   : > { %1838 = shalt.err (!%p1835_p0)
}
  0x29   : > { %s1946_s6 = smov [#allocation8]   ;;  %p26_p2 = scmp.eq.s32.totalorder %s25_s29, 0 }
  0x2a   : > { %1736 = dma.vmem_to_smem (!%p2039_p11), %s145_s26, 16, %s1946_s6, [#allocation9]  }
  0x2b   : > { %s28_s7 = sadd.s32 1, %s1939_s14  ;;  %p35_p1 = scmp.ne.s32.totalorder %s1939_s14, %s1935_s13 }
  0x2c   : > { %p36_p9 = scmp.eq.s32.totalorder %s1943_s15, 0  ;;  %p2685_p6 = scmp.eq.s32.totalorder %s2005_s16, 1 }
  0x2d   : > { %s2059_s8 = scalar_select %p26_p2, %s1939_s14, %s28_s7  }
  0x2e   : > { %p37_p4 = por %p36_p9, %p35_p1  ;;  %p2063_p8 = por %p2685_p6, %p35_p1 }
  0x2f   : > { %p1747_p13 = scmp.lt.s32.totalorder %s1943_s15, 2  ;;  %s155_s10 = sand.u32 1, %s1939_s14  }
  0x30   : > { %s1603_s11 = sshll.u32 %s155_s10, 3  ;;  %s1716_s17 = sshll.u32 %s1943_s15, 7 }
  0x31   : > { %s2073_s22 = scalar_lea.hbm %s2674_s0, %s1716_s17  ;;  %s159_s24 = scalar_lea.vmem [#allocation3], %s1603_s11 }
  0x32   : > { %s167_s25 = sshll.u32 %s159_s24, 4  ;;  %p2077_p11 = pnand %p1747_p13, %p37_p4  ;;  %s2075_s25 = int_to_ptr.vmem [resolvable:$true] %s167_s25 }
  0x33   : > { %s156_s27 = scalar_lea.sflag [#allocation4], %s155_s10  ;;  %s1839_s29 = scalar_lea.hbm %s2073_s22, 128 }
  0x34   : > { %p1840_p3 = scmp.ne.s32.totalorder %s2073_s22, %s1839_s29  ;;  %p1841_p5 = pneg %p2077_p11 }
  0x35   : > { %s1844_s5 = scalar_lea.hbm %s2674_s0, 256  ;;  %p1845_p12 = scmp.lt.u32.totalorder %s2073_s22, %s2674_s0 }
  0x36   : > { %p1842_p7 = pnand %p1841_p5, %p1840_p3  ;;  %p1846_p0 = scmp.lt.u32.totalorder %s1844_s5, %s1839_s29 }
  0x37   : > { %p1848_p1 = scmp.lt.u32.totalorder %s1839_s29, %s2073_s22 }
  0x38   : > { %p1843_p10 = pneg %p1842_p7  ;;  %p1847_p2 = por %p1846_p0, %p1845_p12 }
  0x3a   : > { %p1849_p9 = por %p1848_p1, %p1847_p2 }
  0x3c   : > { %p1850_p4 = pnand %p1849_p9, %p1843_p10 }
  0x3e   : > { %1853 = shalt.err (!%p1850_p4)
}
  0x3f   : > { %s1854_s10 = scalar_lea.vmem %s2075_s25, 128  ;;  %s1947_s11 = smov [#allocation3]  }
  0x40   : > { %p1855_p6 = scmp.ne.s32.totalorder %s2075_s25, %s1854_s10  ;;  %s1859_s17 = sshll.u32 %s1947_s11, 4  ;;  %s1860_s17 = int_to_ptr.vmem [resolvable:$false] %s1859_s17 }
  0x41   : > { %s1861_s20 = scalar_lea.vmem %s1860_s17, 256  ;;  %p1862_p7 = scmp.lt.s32.totalorder %s2075_s25, %s1860_s17 }
  0x42   : > { %p1857_p13 = pnand %p1855_p6, %p1841_p5  ;;  %p1863_p12 = scmp.lt.s32.totalorder %s1861_s20, %s1854_s10 }
  0x44   : > { %p1858_p3 = pneg %p1857_p13  ;;  %p1864_p0 = por %p1863_p12, %p1862_p7 }
  0x46   : > { %p1865_p2 = pnand %p1864_p0, %p1858_p3 }
  0x48   : > { %1868 = shalt.err (!%p1865_p2)
}
  0x49   : > { %1740 = dma.hbm_to_vmem [thread:$0]  (!%p2077_p11), %s2073_s22, 128, %s2075_s25, %s156_s27  }
  0x4a   : > { %p2688_p10 = scmp.ne.s32.totalorder %s2683_s23, 0 }
  0x4b   : > { %s2109_s21 = sand.u32 (!%p2688_p10), 1, %s1935_s13   ;;  %p2689_p5 = scmp.ne.s32.totalorder (!%p2688_p10), %s2681_s18, 0 }
  0x4c   : > { %176 = sbr.rel (%p2688_p10) target bundleno = 690 (0x2b2), region = 32  ;;  %s1607_s24 = sshll.u32 (!%p2688_p10), %s2109_s21, 3 }
  0x4d   : > { %s179_s29 = scalar_lea.sflag (!%p2688_p10), [#allocation4], %s2109_s21  ;;  %s2115_s30 = scalar_lea.vmem (!%p2688_p10), [#allocation3], %s1607_s24 }
  0x53   : > { %1914 = dma.done.wait (%p2689_p5), %s179_s29, 128  }
  0x54   : > { %1916 = vsyncadd (%p2689_p5), %s179_s29, 4294967168  ;;  %p2690_p11 = scmp.eq.s32.totalorder %s2005_s16, 0 }
  0x56   : > { %1918 = dma.done.wait (%p2690_p11), [#allocation6], 16   ;;  %p2691_p1 = pmov %p2690_p11 }
  0x58   : > { %1920 = vsyncadd (%p2691_p1), [#allocation6], 4294967280  ;;  %p2692_p9 = pmov %p2691_p1 }
  0x59   : > { %p2693_p4 = pmov %p2691_p1 }
  0x5a   : > { %1922 = dma.done.wait (%p2692_p9), [#allocation9], 16  }
  0x5b   : > { %1924 = vsyncadd (%p2693_p4), [#allocation9], 4294967280 }
  0x5c   : > { %195 = sfence }
  0x5d   : > { %v214_v0 = vld [vmem:[%s2115_s30] sm:$0xff]  ;;  %vm219_vm0 = vcmask 1043456   ;;  %v253_v1 = vlaneseq  ;;  %v1948_v9 = vmov 0.0   ;;  %v1949_v17 = vmov 1966171168   ;;  %s1950_s18 = smov 51  }
  0x5e   : > { %v217_v2 = vcombine.high %v214_v0, %v214_v0  ;;  %v220_v3 = vsel %vm219_vm0, %v214_v0, -inf  ;;  %v237_v4 = vsel %vm219_vm0, %v214_v0, 0.0  ;;  %v269_v18 = vunpack.c.l.s4 %v1949_v17  ;;  %s1613_s23 = sld [smem:[#allocation7 + $0x15]]  ;;  %s1611_s22 = sld [smem:[#allocation7 + $0x7]] }
  0x5f   : > { %v221_v5 = vrot.slane %v220_v3, 4  ;;  %v238_v6 = vrot.slane %v237_v4, 4  ;;  %vm255_vm1 = vcmp.lt.s32.totalorder %v253_v1, 51  ;;  %vm2132_vm2 = vcmp.ge.s32.totalorder %v253_v1, 51  ;;  %s1626_s25 = sld [smem:[#allocation7 + $0xf]]  ;;  %s1612_s26 = sld [smem:[#allocation7 + $0xe]] }
  0x60   : > { %v227_v7 = vsel %vm219_vm0, %v217_v2, -inf  ;;  %v244_v8 = vsel %vm219_vm0, %v217_v2, 0.0  ;;  %257 = vst.msk [vmem:[#allocation2] sm:$0x1] %vm255_vm1, %v1948_v9  ;;  %263 = vst.msk [vmem:[#allocation2 + $0x3] sm:$0x1] %vm255_vm1, %v1948_v9  ;;  %v270_v27 = vunpack.c.0.s8 %v269_v18 }
  0x61   : > { %v222_v11 = vmax.f32 %v220_v3, %v221_v5  ;;  %v228_v12 = vrot.slane %v227_v7, 4  ;;  %v239_v13 = vadd.f32 %v238_v6, %v237_v4  ;;  %v245_v14 = vrot.slane %v244_v8, 4  ;;  %s1627_s27 = sld [smem:[#allocation7 + $0x16]]  ;;  %s1625_s4 = sld [smem:[#allocation7 + $0x8]] }
  0x62   : > { %vm259_vm3 = vcmp.lt.s32.totalorder %v253_v1, 102  ;;  %v2140_v28 = vshrl.u32 %v253_v1, 7  ;;  %vm288_vm5 = vcmp.lt.s32.totalorder %v253_v1, 307  ;;  %vm285_vm6 = vcmask 416768   ;;  %s1653_s5 = sld [smem:[#allocation7 + $0xa]]  ;;  %s1639_s6 = sld [smem:[#allocation7 + $0x9]] }
  0x63   : > { %v223_v15 = vrot.slane %v222_v11, 2  ;;  %v229_v16 = vmax.f32 %v227_v7, %v228_v12  ;;  %vm260_vm4 = vmand %vm2132_vm2, %vm259_vm3  ;;  %v240_v19 = vrot.slane %v239_v13, 2  ;;  %v246_v20 = vadd.f32 %v245_v14, %v244_v8  ;;  %s1951_s7 = smov 80   ;;  %s1952_s10 = smov 112  }
  0x64   : > { %261 = vst.msk [vmem:[#allocation2 + $0x2] sm:$0x1] %vm260_vm4, %v1948_v9  ;;  %264 = vst.msk [vmem:[#allocation2 + $0x5] sm:$0x1] %vm260_vm4, %v1948_v9  ;;  %v273_v36 = vsub.s32 %v270_v27, %v2140_v28  ;;  %v370_v52 = vstv %s1613_s23  ;;  %v348_v53 = vstv %s1611_s22  ;;  %s1641_s11 = sld [smem:[#allocation7 + $0x17]]  ;;  %s1640_s17 = sld [smem:[#allocation7 + $0x10]] }
  0x65   : > { %v224_v21 = vmax.f32 %v222_v11, %v223_v15  ;;  %v230_v22 = vrot.slane %v229_v16, 2  ;;  %v241_v23 = vadd.f32 %v240_v19, %v239_v13  ;;  %v247_v24 = vrot.slane %v246_v20, 2  ;;  %vm289_vm7 = vmand %vm2132_vm2, %vm288_vm5  ;;  %s1953_s20 = smov 96   ;;  %s1654_s29 = sld [smem:[#allocation7 + $0x11]] }
  0x66   : > { %v515_v57 = vstv %s1626_s25  ;;  %v359_v58 = vstv %s1612_s26  ;;  %s1642_s23 = sld [smem:[#allocation7 + $0x1e]]  ;;  %s1667_s22 = sld [smem:[#allocation7 + $0xb]]  ;;  %vm354_vm8 = vcmask 916480   ;;  %vm365_vm9 = vcmask 785408  }
  0x67   : > { %v225_v25 = vrot.slane %v224_v21, 1  ;;  %v231_v26 = vmax.f32 %v229_v16, %v230_v22  ;;  %v242_v29 = vrot.slane %v241_v23, 1  ;;  %v248_v30 = vadd.f32 %v247_v24, %v246_v20  ;;  %s1681_s25 = sld [smem:[#allocation7 + $0xc]] }
  0x68   : > { %v525_v61 = vstv %s1627_s27  ;;  %v505_v62 = vstv %s1625_s4  ;;  %v825_v2 = vstv %s1653_s5  ;;  %v665_v3 = vstv %s1639_s6  ;;  %s1629_s26 = sld [smem:[#allocation7 + $0x24]]  ;;  %s1630_s27 = sld [smem:[#allocation7 + $0x2b]] }
  0x69   : > { %v226_v31 = vmax.f32 %v224_v21, %v225_v25  ;;  %v232_v32 = vrot.slane %v231_v26, 1  ;;  %v243_v33 = vadd.f32 %v242_v29, %v241_v23  ;;  %v249_v34 = vrot.slane %v248_v30, 1  ;;  %s1668_s4 = sld [smem:[#allocation7 + $0x12]]  ;;  %s1954_s5 = smov 64  }
  0x6a   : > { %v685_v6 = vstv %s1641_s11  ;;  %v675_v7 = vstv %s1640_s17  ;;  %s1669_s6 = sld [smem:[#allocation7 + $0x19]]  ;;  %s1655_s11 = sld [smem:[#allocation7 + $0x18]]  ;;  %vm376_vm10 = vcmask 654336   ;;  %vm387_vm11 = vcmask 523264  }
  0x6b   : > { %v233_v35 = vmax.f32 %v231_v26, %v232_v32  ;;  %v250_v37 = vadd.f32 %v249_v34, %v248_v30  ;;  %v251_v38 = vmul.f32 0.25, %v243_v33  ;;  %v835_v10 = vstv %s1654_s29  ;;  %s1695_s17 = sld [smem:[#allocation7 + $0xd]] }
  0x6c   : > { %v695_v14 = vstv %s1642_s23  ;;  %v979_v15 = vstv %s1667_s22  ;;  %s1643_s29 = sld [smem:[#allocation7 + $0x25]]  ;;  %s1644_s23 = sld [smem:[#allocation7 + $0x2c]]  ;;  %vm398_vm12 = vcmask 392192   ;;  %vm409_vm13 = vcmask 261120  }
  0x6d   : > { %v267_v39 = vcombine.low %v226_v31, %v233_v35  ;;  %v252_v40 = vmul.f32 0.25, %v250_v37  ;;  %v1141_v18 = vstv %s1681_s25  ;;  %s1682_s22 = sld [smem:[#allocation7 + $0x13]]  ;;  %s1956_s25 = smov 32   ;;  %vm651_vm14 = vcmask 1039360  }
  0x6e   : > { %v545_v19 = vstv %s1629_s26  ;;  %v555_v22 = vstv %s1630_s27  ;;  %s1683_s26 = sld [smem:[#allocation7 + $0x1a]]  ;;  %s1656_s27 = sld [smem:[#allocation7 + $0x1f]]  ;;  %vm811_vm15 = vcmask 1031168   ;;  %vm1127_vm4 = vcmask 1014784  }
  0x6f   : > { %v274_v41 = vrot.slane %v267_v39, %v273_v36  ;;  %v293_v42 = vcombine.low %v251_v38, %v252_v40  ;;  %v989_v23 = vstv %s1668_s4  ;;  %s1657_s4 = sld [smem:[#allocation7 + $0x26]] }
  0x70   : > { %v999_v26 = vstv %s1669_s6  ;;  %v845_v27 = vstv %s1655_s11  ;;  %s1670_s6 = sld [smem:[#allocation7 + $0x20]]  ;;  %s1671_s11 = sld [smem:[#allocation7 + $0x27]] }
  0x71   : > { %v281_v43 = vrot.slane %v274_v41, %v273_v36  ;;  %v300_v44 = vrot.slane %v293_v42, %v273_v36  ;;  %v1301_v31 = vstv %s1695_s17  ;;  %s1696_s17 = sld [smem:[#allocation7 + $0x14]] }
  0x72   : > { %v705_v32 = vstv %s1643_s29  ;;  %v715_v35 = vstv %s1644_s23  ;;  %s1697_s29 = sld [smem:[#allocation7 + $0x1b]]  ;;  %s1684_s23 = sld [smem:[#allocation7 + $0x21]] }
  0x73   : > { %282 = vrot.lane.b32.xlu0 %v281_v43, %s1950_s18  ;;  %v307_v45 = vrot.slane %v300_v44, %v273_v36  ;;  %v1151_v36 = vstv %s1682_s22  ;;  %s1672_s22 = sld [smem:[#allocation7 + $0x2e]] }
  0x74   : > { %v1161_v39 = vstv %s1683_s26  ;;  %v855_v40 = vstv %s1656_s27  ;;  %s1658_s26 = sld [smem:[#allocation7 + $0x2d]]  ;;  %s1698_s27 = sld [smem:[#allocation7 + $0x22]] }
  0x75   : > { %v865_v43 = vstv %s1657_s4  ;;  %s1685_s4 = sld [smem:[#allocation7 + $0x28]] }
  0x76   : > { %v1009_v44 = vstv %s1670_s6  ;;  %s1699_s6 = sld [smem:[#allocation7 + $0x29]] }
  0x77   : > { %308 = vrot.lane.b32.xlu0 %v307_v45, %s1950_s18  ;;  %s1628_s18 = sld [smem:[#allocation7 + $0x1d]] }
  0x7d   : > { %v535_v11 = vstv %s1628_s18  ;;  %s1955_s18 = smov 48  }
  0xe5   : > { %v283_v46 = vpop.permute.xlu0 %282 }
  0xe6   : > { %v284_v47 = vrot.slane %v283_v46, 7 }
  0xe8   : > { %v286_v48 = vsel %vm285_vm6, %v284_v47, %v283_v46  ;;  %v1019_v47 = vstv %s1671_s11  ;;  %s1686_s11 = sld [smem:[#allocation7 + $0x2f]] }
  0xe9   : > { %290 = vst.msk [vmem:[#allocation2] sm:$0x7] %vm289_vm7, %v286_v48  ;;  %v309_v49 = vpop.permute.xlu0 %308  ;;  %v1311_v48 = vstv %s1696_s17  ;;  %s1633_s17 = sld [smem:[#allocation7 + $0x40]] }
  0xea   : > { %v310_v50 = vrot.slane %v309_v49, 7 }
  0xec   : > { %v311_v51 = vsel %vm285_vm6, %v310_v50, %v309_v49 }
  0xed   : > { %313 = vst.msk [vmem:[#allocation2 + $0x3] sm:$0x7] %vm289_vm7, %v311_v51  ;;  %v1321_v51 = vstv %s1697_s29  ;;  %s1700_s29 = sld [smem:[#allocation7 + $0x30]]  ;;  %vm967_vm7 = vcmask 1022976  }
  0xf0   : > { %v2146_v54 = vld [vmem:[#allocation2] sm:$0x7] }
  0xf1   : > { %v371_v55 = vmul.f32 %v370_v52, %v2146_v54  ;;  %v349_v56 = vmul.f32 %v348_v53, %v2146_v54  ;;  %v516_v59 = vmul.f32 %v515_v57, %v2146_v54  ;;  %v360_v60 = vmul.f32 %v359_v58, %v2146_v54 }
  0xf2   : > { %v526_v63 = vmul.f32 %v525_v61, %v2146_v54  ;;  %v506_v0 = vmul.f32 %v505_v62, %v2146_v54  ;;  %v826_v4 = vmul.f32 %v825_v2, %v2146_v54  ;;  %v666_v5 = vmul.f32 %v665_v3, %v2146_v54 }
  0xf3   : > { %373 = vrot.lane.b32.xlu0 %v371_v55, %s1951_s7  ;;  %351 = vrot.lane.b32.xlu1 %v349_v56, %s1952_s10  ;;  %v686_v8 = vmul.f32 %v685_v6, %v2146_v54  ;;  %v676_v9 = vmul.f32 %v675_v7, %v2146_v54  ;;  %v836_v12 = vmul.f32 %v835_v10, %v2146_v54  ;;  %v1171_v52 = vstv %s1684_s23  ;;  %s1647_s23 = sld [smem:[#allocation7 + $0x41]] }
  0xf4   : > { %v536_v13 = vmul.f32 %v535_v11, %v2146_v54  ;;  %v696_v16 = vmul.f32 %v695_v14, %v2146_v54  ;;  %v980_v17 = vmul.f32 %v979_v15, %v2146_v54  ;;  %v1142_v20 = vmul.f32 %v1141_v18, %v2146_v54  ;;  %v2220_v3 = vld [vmem:[#allocation2 + $0x3] sm:$0x7] }
  0xf5   : > { %v546_v21 = vmul.f32 %v545_v19, %v2146_v54  ;;  %v556_v24 = vmul.f32 %v555_v22, %v2146_v54  ;;  %v990_v25 = vmul.f32 %v989_v23, %v2146_v54  ;;  %v1000_v29 = vmul.f32 %v999_v26, %v2146_v54 }
  0xf6   : > { %v846_v30 = vmul.f32 %v845_v27, %v2146_v54  ;;  %v1302_v33 = vmul.f32 %v1301_v31, %v2146_v54  ;;  %v706_v34 = vmul.f32 %v705_v32, %v2146_v54  ;;  %v716_v37 = vmul.f32 %v715_v35, %v2146_v54 }
  0xf7   : > { %518 = vrot.lane.b32.xlu0 %v516_v59, %s1953_s20  ;;  %362 = vrot.lane.b32.xlu1 %v360_v60, %s1953_s20  ;;  %v1152_v38 = vmul.f32 %v1151_v36, %v2146_v54  ;;  %v1162_v41 = vmul.f32 %v1161_v39, %v2146_v54  ;;  %v856_v42 = vmul.f32 %v855_v40, %v2146_v54  ;;  %v1029_v56 = vstv %s1672_s22  ;;  %s1632_s22 = sld [smem:[#allocation7 + $0x39]] }
  0xf8   : > { %v866_v45 = vmul.f32 %v865_v43, %v2146_v54  ;;  %v1010_v46 = vmul.f32 %v1009_v44, %v2146_v54  ;;  %v1020_v49 = vmul.f32 %v1019_v47, %v2146_v54  ;;  %v1312_v50 = vmul.f32 %v1311_v48, %v2146_v54 }
  0xf9   : > { %v1322_v53 = vmul.f32 %v1321_v51, %v2146_v54  ;;  %v1172_v55 = vmul.f32 %v1171_v52, %v2146_v54  ;;  %v875_v57 = vstv %s1658_s26  ;;  %v1030_v58 = vmul.f32 %v1029_v56, %v2146_v54  ;;  %s1635_s26 = sld [smem:[#allocation7 + $0x4e]] }
  0xfa   : > { %v876_v59 = vmul.f32 %v875_v57, %v2146_v54  ;;  %v1331_v60 = vstv %s1698_s27  ;;  %v1181_v61 = vstv %s1685_s4  ;;  %v1191_v2 = vstv %s1686_s11  ;;  %s1646_s27 = sld [smem:[#allocation7 + $0x3a]]  ;;  %s1674_s4 = sld [smem:[#allocation7 + $0x3c]] }
  0xfb   : > { %528 = vrot.lane.b32.xlu0 %v526_v63, %s1951_s7  ;;  %508 = vrot.lane.b32.xlu1 %v506_v0, %s1952_s10  ;;  %v1332_v62 = vmul.f32 %v1331_v60, %v2146_v54  ;;  %v1182_v63 = vmul.f32 %v1181_v61, %v2146_v54  ;;  %v1341_v0 = vstv %s1699_s6  ;;  %v1192_v6 = vmul.f32 %v1191_v2, %v2146_v54  ;;  %s1634_s6 = sld [smem:[#allocation7 + $0x47]]  ;;  %s1661_s11 = sld [smem:[#allocation7 + $0x42]] }
  0xfc   : > { %v1351_v7 = vstv %s1700_s29  ;;  %v739_v10 = vstv %s1647_s23  ;;  %s1649_s29 = sld [smem:[#allocation7 + $0x4f]]  ;;  %s1648_s23 = sld [smem:[#allocation7 + $0x48]] }
  0xfd   : > { %v569_v11 = vstv %s1632_s22  ;;  %s1688_s22 = sld [smem:[#allocation7 + $0x3d]] }
  0xff   : > { %828 = vrot.lane.b32.xlu0 %v826_v4, %s1952_s10  ;;  %668 = vrot.lane.b32.xlu1 %v666_v5, %s1952_s10  ;;  %v579_v4 = vstv %s1633_s17  ;;  %v1342_v5 = vmul.f32 %v1341_v0, %v2146_v54  ;;  %v599_v14 = vstv %s1635_s26  ;;  %s1660_s17 = sld [smem:[#allocation7 + $0x3b]]  ;;  %s1636_s26 = sld [smem:[#allocation7 + $0x55]] }
 0x100   : > { %v729_v15 = vstv %s1646_s27  ;;  %v1043_v18 = vstv %s1674_s4  ;;  %s1637_s27 = sld [smem:[#allocation7 + $0x5c]]  ;;  %s1675_s4 = sld [smem:[#allocation7 + $0x43]] }
 0x101   : > { %v589_v19 = vstv %s1634_s6  ;;  %v899_v22 = vstv %s1661_s11  ;;  %s1676_s6 = sld [smem:[#allocation7 + $0x4a]]  ;;  %s1662_s11 = sld [smem:[#allocation7 + $0x49]] }
 0x102   : > { %v759_v26 = vstv %s1649_s29  ;;  %v749_v27 = vstv %s1648_s23  ;;  %s1650_s29 = sld [smem:[#allocation7 + $0x56]]  ;;  %s1651_s23 = sld [smem:[#allocation7 + $0x5d]] }
 0x103   : > { %688 = vrot.lane.b32.xlu0 %v686_v8, %s1951_s7  ;;  %678 = vrot.lane.b32.xlu1 %v676_v9, %s1953_s20  ;;  %v580_v8 = vmul.f32 %v579_v4, %v2220_v3  ;;  %v1352_v9 = vmul.f32 %v1351_v7, %v2146_v54  ;;  %v1205_v31 = vstv %s1688_s22  ;;  %s1689_s22 = sld [smem:[#allocation7 + $0x44]] }
 0x105   : > { %v889_v23 = vstv %s1660_s17  ;;  %v609_v32 = vstv %s1636_s26  ;;  %s1702_s17 = sld [smem:[#allocation7 + $0x3e]]  ;;  %s1690_s26 = sld [smem:[#allocation7 + $0x4b]] }
 0x106   : > { %v619_v35 = vstv %s1637_s27  ;;  %v1053_v36 = vstv %s1675_s4  ;;  %s1663_s27 = sld [smem:[#allocation7 + $0x50]]  ;;  %s1664_s4 = sld [smem:[#allocation7 + $0x57]] }
 0x107   : > { %838 = vrot.lane.b32.xlu0 %v836_v12, %s1953_s20  ;;  %538 = vrot.lane.b32.xlu1 %v536_v13, %s1954_s5  ;;  %v740_v12 = vmul.f32 %v739_v10, %v2220_v3  ;;  %v570_v13 = vmul.f32 %v569_v11, %v2220_v3  ;;  %v1063_v39 = vstv %s1676_s6  ;;  %v909_v40 = vstv %s1662_s11  ;;  %s1677_s6 = sld [smem:[#allocation7 + $0x51]] }
 0x108   : > { %v769_v44 = vstv %s1650_s29  ;;  %v779_v47 = vstv %s1651_s23  ;;  %s2266_s11 = sld [smem:[#allocation7 + $0x1]]  ;;  %s2276_s29 = sld [smem:[#allocation7 + $0x45]] }
 0x109   : > { %v1215_v48 = vstv %s1689_s22  ;;  %v780_v51 = vmul.f32 %v779_v47, %v2220_v3  ;;  %s2280_s23 = sld [smem:[#allocation7 + $0x2]]  ;;  %s2282_s22 = sld [smem:[#allocation7 + $0x3]] }
 0x10a   : > { %v1216_v52 = vmul.f32 %v1215_v48, %v2220_v3 }
 0x10b   : > { %698 = vrot.lane.b32.xlu0 %v696_v16, %s1954_s5  ;;  %982 = vrot.lane.b32.xlu1 %v980_v17, %s1952_s10  ;;  %v600_v16 = vmul.f32 %v599_v14, %v2220_v3  ;;  %v730_v17 = vmul.f32 %v729_v15, %v2220_v3  ;;  %v1365_v43 = vstv %s1702_s17  ;;  %s2274_s17 = sld [smem:[#allocation7 + $0x52]] }
 0x10c   : > { %v929_v60 = vstv %s1664_s4  ;;  %s2299_s4 = sld [smem:[#allocation7 + $0x59]] }
 0x10d   : > { %v1073_v61 = vstv %s1677_s6  ;;  %v930_v2 = vmul.f32 %v929_v60, %v2220_v3  ;;  %s2301_s6 = sld [smem:[#allocation7 + $0x4c]] }
 0x10e   : > { %v1074_v4 = vmul.f32 %v1073_v61, %v2220_v3 }
 0x10f   : > { %1144 = vrot.lane.b32.xlu0 %v1142_v20, %s1952_s10  ;;  %548 = vrot.lane.b32.xlu1 %v546_v21, %s1955_s18  ;;  %v1044_v20 = vmul.f32 %v1043_v18, %v2220_v3  ;;  %v590_v21 = vmul.f32 %v589_v19, %v2220_v3 }
 0x111   : > { %v1235_v7 = vstv %s2274_s17  ;;  %s2316_s17 = sld [smem:[#allocation7 + $0x5f]] }
 0x113   : > { %558 = vrot.lane.b32.xlu0 %v556_v24, %s1956_s25  ;;  %992 = vrot.lane.b32.xlu1 %v990_v25, %s1953_s20  ;;  %v900_v24 = vmul.f32 %v899_v22, %v2220_v3  ;;  %v890_v25 = vmul.f32 %v889_v23, %v2220_v3 }
 0x117   : > { %1002 = vrot.lane.b32.xlu0 %v1000_v29, %s1951_s7  ;;  %848 = vrot.lane.b32.xlu1 %v846_v30, %s1951_s7  ;;  %v760_v29 = vmul.f32 %v759_v26, %v2220_v3  ;;  %v750_v30 = vmul.f32 %v749_v27, %v2220_v3 }
 0x11b   : > { %1304 = vrot.lane.b32.xlu0 %v1302_v33, %s1952_s10  ;;  %708 = vrot.lane.b32.xlu1 %v706_v34, %s1955_s18  ;;  %v1206_v33 = vmul.f32 %v1205_v31, %v2220_v3  ;;  %v610_v34 = vmul.f32 %v609_v32, %v2220_v3 }
 0x11f   : > { %718 = vrot.lane.b32.xlu0 %v716_v37, %s1956_s25  ;;  %1154 = vrot.lane.b32.xlu1 %v1152_v38, %s1953_s20  ;;  %v620_v37 = vmul.f32 %v619_v35, %v2220_v3  ;;  %v1054_v38 = vmul.f32 %v1053_v36, %v2220_v3 }
 0x123   : > { %1164 = vrot.lane.b32.xlu0 %v1162_v41, %s1951_s7  ;;  %858 = vrot.lane.b32.xlu1 %v856_v42, %s1954_s5  ;;  %v1064_v41 = vmul.f32 %v1063_v39, %v2220_v3  ;;  %v910_v42 = vmul.f32 %v909_v40, %v2220_v3  ;;  %v1245_v40 = vstv %s2299_s4  ;;  %s2347_s4 = sld [smem:[#allocation7 + $0x5a]] }
 0x124   : > { %v1246_v47 = vmul.f32 %v1245_v40, %v2220_v3 }
 0x127   : > { %868 = vrot.lane.b32.xlu0 %v866_v45, %s1955_s18  ;;  %1012 = vrot.lane.b32.xlu1 %v1010_v46, %s1954_s5  ;;  %v1366_v45 = vmul.f32 %v1365_v43, %v2220_v3  ;;  %v770_v46 = vmul.f32 %v769_v44, %v2220_v3 }
 0x12b   : > { %1022 = vrot.lane.b32.xlu0 %v1020_v49, %s1955_s18  ;;  %1314 = vrot.lane.b32.xlu1 %v1312_v50, %s1953_s20 }
 0x12f   : > { %1324 = vrot.lane.b32.xlu0 %v1322_v53, %s1951_s7  ;;  %1174 = vrot.lane.b32.xlu1 %v1172_v55, %s1954_s5  ;;  %v1225_v53 = vstv %s1690_s26  ;;  %v919_v55 = vstv %s1663_s27  ;;  %s2288_s26 = sld [smem:[#allocation7 + $0x5e]]  ;;  %s2290_s27 = sld [smem:[#allocation7 + $0x58]] }
 0x133   : > { %1032 = vrot.lane.b32.xlu0 %v1030_v58, %s1956_s25  ;;  %878 = vrot.lane.b32.xlu1 %v876_v59, %s1956_s25  ;;  %v1226_v58 = vmul.f32 %v1225_v53, %v2220_v3  ;;  %v920_v59 = vmul.f32 %v919_v55, %v2220_v3  ;;  %v1093_v55 = vstv %s2316_s17  ;;  %s2364_s17 = sld [smem:[#allocation7 + $0x32]] }
 0x135   : > { %v939_v19 = vstv %s2288_s26  ;;  %v1083_v23 = vstv %s2290_s27  ;;  %s2339_s26 = sld [smem:[#allocation7 + $0x5]]  ;;  %s2345_s27 = sld [smem:[#allocation7 + $0x23]] }
 0x136   : > { %v940_v31 = vmul.f32 %v939_v19, %v2220_v3 }
 0x137   : > { %1334 = vrot.lane.b32.xlu0 %v1332_v62, %s1954_s5  ;;  %1184 = vrot.lane.b32.xlu1 %v1182_v63, %s1955_s18  ;;  %v501_v62 = vstv %s2266_s11  ;;  %s2309_s11 = sld [smem:[#allocation7 + $0x60]] }
 0x13b   : > { %1344 = vrot.lane.b32.xlu0 %v1342_v5, %s1955_s18  ;;  %1194 = vrot.lane.b32.xlu1 %v1192_v6, %s1956_s25 }
 0x13d   : > { %v1255_v43 = vstv %s2309_s11  ;;  %s2362_s11 = sld [smem:[#allocation7 + $0x38]] }
 0x13f   : > { %1354 = vrot.lane.b32.xlu1 %v1352_v9, %s1956_s25  ;;  %582 = vrot.lane.b32.xlu0 %v580_v8, %s1953_s20  ;;  %v1375_v8 = vstv %s2276_s29  ;;  %v502_v9 = vmul.f32 %v501_v62, %v2146_v54  ;;  %s2326_s29 = sld [smem:[#allocation7 + $0x4]] }
 0x140   : > { %v1376_v18 = vmul.f32 %v1375_v8, %v2220_v3 }
 0x143   : > { %742 = vrot.lane.b32.xlu0 %v740_v12, %s1953_s20  ;;  %572 = vrot.lane.b32.xlu1 %v570_v13, %s1952_s10  ;;  %v661_v12 = vstv %s2280_s23  ;;  %v821_v13 = vstv %s2282_s22  ;;  %s2331_s23 = sld [smem:[#allocation7 + $0x61]]  ;;  %s2333_s22 = sld [smem:[#allocation7 + $0x53]] }
 0x144   : > { %v822_v26 = vmul.f32 %v821_v13, %v2146_v54 }
 0x145   : > { %v975_v60 = vstv %s2326_s29  ;;  %s2378_s29 = sld [smem:[#allocation7 + $0x2a]] }
 0x147   : > { %602 = vrot.lane.b32.xlu0 %v600_v16, %s1954_s5  ;;  %732 = vrot.lane.b32.xlu1 %v730_v17, %s1952_s10  ;;  %v1236_v17 = vmul.f32 %v1235_v7, %v2220_v3 }
 0x149   : > { %v1415_v7 = vstv %s2331_s23  ;;  %v1395_v8 = vstv %s2333_s22  ;;  %s2380_s23 = sld [smem:[#allocation7 + $0x46]] }
 0x14a   : > { %s2388_s22 = sld [smem:[#allocation7 + $0x6]] }
 0x14b   : > { %1046 = vrot.lane.b32.xlu0 %v1044_v20, %s1952_s10  ;;  %592 = vrot.lane.b32.xlu1 %v590_v21, %s1951_s7 }
 0x14f   : > { %902 = vrot.lane.b32.xlu0 %v900_v24, %s1953_s20  ;;  %892 = vrot.lane.b32.xlu1 %v890_v25, %s1952_s10  ;;  %v662_v25 = vmul.f32 %v661_v12, %v2146_v54  ;;  %v1137_v12 = vstv %s2339_s26  ;;  %s2395_s26 = sld [smem:[#allocation7 + $0x3f]] }
 0x153   : > { %762 = vrot.lane.b32.xlu0 %v760_v29, %s1954_s5  ;;  %752 = vrot.lane.b32.xlu1 %v750_v30, %s1951_s7 }
 0x157   : > { %1208 = vrot.lane.b32.xlu0 %v1206_v33, %s1952_s10  ;;  %612 = vrot.lane.b32.xlu1 %v610_v34, %s1955_s18 }
 0x15b   : > { %622 = vrot.lane.b32.xlu0 %v620_v37, %s1956_s25  ;;  %1056 = vrot.lane.b32.xlu1 %v1054_v38, %s1953_s20  ;;  %v1084_v37 = vmul.f32 %v1083_v23, %v2220_v3  ;;  %v1138_v23 = vmul.f32 %v1137_v12, %v2146_v54 }
 0x15f   : > { %1066 = vrot.lane.b32.xlu0 %v1064_v41, %s1951_s7  ;;  %912 = vrot.lane.b32.xlu1 %v910_v42, %s1951_s7  ;;  %v1385_v41 = vstv %s2301_s6  ;;  %s2354_s6 = sld [smem:[#allocation7 + $0x1c]] }
 0x160   : > { %v1386_v48 = vmul.f32 %v1385_v41, %v2220_v3 }
 0x163   : > { %1368 = vrot.lane.b32.xlu0 %v1366_v45, %s1952_s10  ;;  %772 = vrot.lane.b32.xlu1 %v770_v46, %s1955_s18 }
 0x165   : > { %v2268_v49 = vpop.permute.xlu1 %351  ;;  %v2270_v50 = vpop.permute.xlu0 %373 }
 0x167   : > { %782 = vrot.lane.b32.xlu0 %v780_v51, %s1956_s25  ;;  %1218 = vrot.lane.b32.xlu1 %v1216_v52, %s1953_s20 }
 0x169   : > { %v2284_v56 = vpop.permute.xlu1 %362  ;;  %v519_v57 = vpop.permute.xlu0 %518 }
 0x16a   : > { %v520_v5 = vrot.slane %v519_v57, 1 }
 0x16b   : > { %1228 = vrot.lane.b32.xlu0 %v1226_v58, %s1951_s7  ;;  %922 = vrot.lane.b32.xlu1 %v920_v59, %s1954_s5 }
 0x16c   : > { %v521_v20 = vsel %vm365_vm9, %v519_v57, %v520_v5 }
 0x16d   : > { %v509_v63 = vpop.permute.xlu1 %508  ;;  %v529_v0 = vpop.permute.xlu0 %528 }
 0x16e   : > { %v510_v6 = vrot.slane %v509_v63, 1  ;;  %v530_v11 = vrot.slane %v529_v0, 1 }
 0x16f   : > { %932 = vrot.lane.b32.xlu0 %v930_v2, %s1955_s18  ;;  %1076 = vrot.lane.b32.xlu1 %v1074_v4, %s1954_s5  ;;  %v1256_v2 = vmul.f32 %v1255_v43, %v2220_v3  ;;  %v1094_v4 = vmul.f32 %v1093_v55, %v2220_v3 }
 0x170   : > { %v511_v10 = vsel %vm354_vm8, %v509_v63, %v510_v6  ;;  %v531_v27 = vsel %vm376_vm10, %v529_v0, %v530_v11 }
 0x171   : > { %v513_v14 = vadd.f32 %v511_v10, %v502_v9  ;;  %v669_v15 = vpop.permute.xlu1 %668  ;;  %v829_v16 = vpop.permute.xlu0 %828  ;;  %v976_v9 = vmul.f32 %v975_v60, %v2146_v54 }
 0x172   : > { %v670_v21 = vrot.slane %v669_v15, 1  ;;  %v830_v22 = vrot.slane %v829_v16, 1 }
 0x173   : > { %v523_v24 = vadd.f32 %v521_v20, %v513_v14  ;;  %1238 = vrot.lane.b32.xlu0 %v1236_v17, %s1954_s5  ;;  %1378 = vrot.lane.b32.xlu1 %v1376_v18, %s1953_s20  ;;  %v1416_v17 = vmul.f32 %v1415_v7, %v2220_v3  ;;  %v1396_v18 = vmul.f32 %v1395_v8, %v2220_v3 }
 0x174   : > { %v671_v29 = vsel %vm354_vm8, %v669_v15, %v670_v21  ;;  %v831_v30 = vsel %vm354_vm8, %v829_v16, %v830_v22  ;;  %v392_v21 = vstv %s2345_s27  ;;  %v1405_v22 = vstv %s2347_s4  ;;  %s2397_s27 = sld [smem:[#allocation7 + $0x54]]  ;;  %s2409_s4 = sld [smem:[#allocation7 + $0x4d]] }
 0x175   : > { %v533_v32 = vadd.f32 %v531_v27, %v523_v24  ;;  %v673_v33 = vadd.f32 %v671_v29, %v662_v25  ;;  %v833_v34 = vadd.f32 %v831_v30, %v822_v26  ;;  %v679_v35 = vpop.permute.xlu1 %678  ;;  %v689_v36 = vpop.permute.xlu0 %688  ;;  %v381_v26 = vstv %s2354_s6  ;;  %s2411_s6 = sld [smem:[#allocation7 + $0x33]] }
 0x176   : > { %v680_v38 = vrot.slane %v679_v35, 1  ;;  %v690_v39 = vrot.slane %v689_v36, 1  ;;  %v382_v40 = vmul.f32 %v381_v26, %v2146_v54 }
 0x177   : > { %942 = vrot.lane.b32.xlu0 %v940_v31, %s1956_s25  ;;  %1086 = vrot.lane.b32.xlu1 %v1084_v37, %s1955_s18  ;;  %v393_v31 = vmul.f32 %v392_v21, %v2146_v54 }
 0x178   : > { %v681_v42 = vsel %vm365_vm9, %v679_v35, %v680_v38  ;;  %v691_v51 = vsel %vm376_vm10, %v689_v36, %v690_v39  ;;  %v420_v35 = vstv %s2362_s11  ;;  %v565_v36 = vstv %s2364_s17  ;;  %s1958_s11 = smov 126   ;;  %s1959_s17 = smov 125  }
 0x179   : > { %v683_v44 = vadd.f32 %v681_v42, %v673_v33  ;;  %v539_v45 = vpop.permute.xlu1 %538  ;;  %v839_v46 = vpop.permute.xlu0 %838 }
 0x17a   : > { %v540_v52 = vrot.slane %v539_v45, 1  ;;  %v840_v53 = vrot.slane %v839_v46, 1  ;;  %v460_v7 = vstv %s2397_s27  ;;  %s1617_s27 = sld [smem:[#allocation7 + $0x31]] }
 0x17b   : > { %v693_v57 = vadd.f32 %v691_v51, %v683_v44  ;;  %1248 = vrot.lane.b32.xlu0 %v1246_v47, %s1955_s18  ;;  %1388 = vrot.lane.b32.xlu1 %v1386_v48, %s1951_s7  ;;  %v403_v51 = vstv %s2378_s29  ;;  %s1960_s29 = smov 124  }
 0x17c   : > { %v541_v58 = vsel %vm387_vm11, %v539_v45, %v540_v52  ;;  %v841_v59 = vsel %vm365_vm9, %v839_v46, %v840_v53  ;;  %v421_v45 = vmul.f32 %v420_v35, %v2220_v3  ;;  %v566_v46 = vmul.f32 %v565_v36, %v2220_v3 }
 0x17d   : > { %v543_v61 = vadd.f32 %v541_v58, %v533_v32  ;;  %v2356_v62 = vadd.f32 %v841_v59, %v833_v34  ;;  %v983_v63 = vpop.permute.xlu1 %982  ;;  %v699_v0 = vpop.permute.xlu0 %698  ;;  %v1406_v32 = vmul.f32 %v1405_v22, %v2220_v3  ;;  %v440_v52 = vstv %s2380_s23  ;;  %s1961_s23 = smov 123  }
 0x17e   : > { %v984_v5 = vrot.slane %v983_v63, 1  ;;  %v700_v6 = vrot.slane %v699_v0, 1  ;;  %v1297_v58 = vstv %s2388_s22  ;;  %s1962_s22 = smov 122  }
 0x17f   : > { %1258 = vrot.lane.b32.xlu0 %v1256_v2, %s1956_s25  ;;  %1096 = vrot.lane.b32.xlu1 %v1094_v4, %s1956_s25  ;;  %v441_v2 = vmul.f32 %v440_v52, %v2220_v3  ;;  %v1298_v8 = vmul.f32 %v1297_v58, %v2146_v54 }
 0x180   : > { %v985_v10 = vsel %vm354_vm8, %v983_v63, %v984_v5  ;;  %v701_v11 = vsel %vm387_vm11, %v699_v0, %v700_v6  ;;  %v404_v0 = vmul.f32 %v403_v51, %v2146_v54  ;;  %v430_v6 = vstv %s2395_s26  ;;  %s341_s26 = sld [smem:[#allocation7]] }
 0x181   : > { %v987_v13 = vadd.f32 %v985_v10, %v976_v9  ;;  %v2372_v14 = vadd.f32 %v701_v11, %v693_v57  ;;  %v549_v15 = vpop.permute.xlu1 %548  ;;  %v1145_v16 = vpop.permute.xlu0 %1144  ;;  %v725_v54 = vstv %s2411_s6  ;;  %s2609_s6 = sld [smem:[#allocation8 + $0x1]] }
 0x182   : > { %v550_v19 = vrot.slane %v549_v15, 1  ;;  %v1146_v20 = vrot.slane %v1145_v16, 1 }
 0x183   : > { %1418 = vrot.lane.b32.xlu0 %v1416_v17, %s1956_s25  ;;  %1398 = vrot.lane.b32.xlu1 %v1396_v18, %s1954_s5  ;;  %v450_v18 = vstv %s2409_s4  ;;  %s2601_s4 = sld [smem:[#allocation8]] }
 0x184   : > { %v551_v24 = vsel %vm398_vm12, %v549_v15, %v550_v19  ;;  %v1147_v25 = vsel %vm354_vm8, %v1145_v16, %v1146_v20  ;;  %v461_v15 = vmul.f32 %v460_v7, %v2220_v3  ;;  %v451_v26 = vmul.f32 %v450_v18, %v2220_v3 }
 0x185   : > { %v2390_v27 = vadd.f32 %v1147_v25, %v1138_v23  ;;  %v993_v29 = vpop.permute.xlu1 %992  ;;  %v559_v30 = vpop.permute.xlu0 %558  ;;  %v553_v37 = vadd.f32 %v551_v24, %v543_v61 }
 0x186   : > { %v994_v33 = vrot.slane %v993_v29, 1  ;;  %v560_v34 = vrot.slane %v559_v30, 1 }
 0x187   : > { %395 = vrot.lane.b32.xlu0 %v393_v31, %s1955_s18  ;;  %1408 = vrot.lane.b32.xlu1 %v1406_v32, %s1955_s18 }
 0x188   : > { %v995_v38 = vsel %vm365_vm9, %v993_v29, %v994_v33  ;;  %v561_v39 = vsel %vm409_vm13, %v559_v30, %v560_v34  ;;  %v726_v29 = vmul.f32 %v725_v54, %v2220_v3 }
 0x189   : > { %v997_v41 = vadd.f32 %v995_v38, %v987_v13  ;;  %v563_v42 = vadd.f32 %v561_v39, %v553_v37  ;;  %v849_v43 = vpop.permute.xlu1 %848  ;;  %v1003_v44 = vpop.permute.xlu0 %1002  ;;  %v431_v13 = vmul.f32 %v430_v6, %v2220_v3 }
 0x18a   : > { %v850_v47 = vrot.slane %v849_v43, 1  ;;  %v1004_v48 = vrot.slane %v1003_v44, 1 }
 0x18b   : > { %384 = vrot.lane.b32.xlu1 %v382_v40, %s1954_s5  ;;  %423 = vrot.lane.b32.xlu0 %v421_v45, %s1952_s10  ;;  %v2415_v53 = vadd.f32 %v566_v46, %v563_v42  ;;  %s2425_s10 = sld [smem:[#allocation7 + $0x5b]] }
 0x18c   : > { %v851_v55 = vsel %vm376_vm10, %v849_v43, %v850_v47  ;;  %v1005_v57 = vsel %vm376_vm10, %v1003_v44, %v1004_v48 }
 0x18d   : > { %v853_v59 = vadd.f32 %v851_v55, %v2356_v62  ;;  %v1007_v60 = vadd.f32 %v1005_v57, %v997_v41  ;;  %v709_v61 = vpop.permute.xlu1 %708  ;;  %v1305_v63 = vpop.permute.xlu0 %1304 }
 0x18e   : > { %v710_v4 = vrot.slane %v709_v61, 1  ;;  %v1306_v5 = vrot.slane %v1305_v63, 1 }
 0x18f   : > { %406 = vrot.lane.b32.xlu1 %v404_v0, %s1956_s25  ;;  %443 = vrot.lane.b32.xlu0 %v441_v2, %s1951_s7  ;;  %s1673_s7 = sld [smem:[#allocation7 + $0x35]] }
 0x190   : > { %v711_v62 = vsel %vm398_vm12, %v709_v61, %v710_v4  ;;  %v1307_v9 = vsel %vm354_vm8, %v1305_v63, %v1306_v5 }
 0x191   : > { %v1309_v10 = vadd.f32 %v1307_v9, %v1298_v8  ;;  %v1155_v11 = vpop.permute.xlu1 %1154  ;;  %v719_v12 = vpop.permute.xlu0 %718  ;;  %v713_v19 = vadd.f32 %v711_v62, %v2372_v14  ;;  %v470_v14 = vstv %s2425_s10  ;;  %s1717_s10 = sshll.u32 %s2005_s16, 7  ;;  %s1963_s16 = smov [#allocation10]  }
 0x192   : > { %v1156_v16 = vrot.slane %v1155_v11, 1  ;;  %v720_v17 = vrot.slane %v719_v12, 1  ;;  %v471_v38 = vmul.f32 %v470_v14, %v2220_v3 }
 0x193   : > { %433 = vrot.lane.b32.xlu1 %v431_v13, %s1953_s20  ;;  %463 = vrot.lane.b32.xlu0 %v461_v15, %s1955_s18  ;;  %s1659_s20 = sld [smem:[#allocation7 + $0x34]]  ;;  %s1701_s18 = sld [smem:[#allocation7 + $0x37]] }
 0x194   : > { %v1157_v20 = vsel %vm365_vm9, %v1155_v11, %v1156_v16  ;;  %v721_v21 = vsel %vm409_vm13, %v719_v12, %v720_v17 }
 0x195   : > { %v1159_v22 = vadd.f32 %v1157_v20, %v2390_v27  ;;  %v723_v23 = vadd.f32 %v721_v21, %v713_v19  ;;  %v859_v24 = vpop.permute.xlu1 %858  ;;  %v1165_v25 = vpop.permute.xlu0 %1164  ;;  %v1039_v62 = vstv %s1673_s7  ;;  %s213_s7 = scalar_lea.vmem [#allocation10], %s1607_s24  ;;  %s1873_s24 = sshll.u32 %s1963_s16, 4  ;;  %s1874_s24 = int_to_ptr.vmem [resolvable:$false] %s1873_s24 }
 0x196   : > { %v860_v30 = vrot.slane %v859_v24, 1  ;;  %v1166_v31 = vrot.slane %v1165_v25, 1  ;;  %v1040_v17 = vmul.f32 %v1039_v62, %v2220_v3 }
 0x197   : > { %453 = vrot.lane.b32.xlu1 %v451_v26, %s1954_s5  ;;  %v2446_v32 = vadd.f32 %v726_v29, %v723_v23  ;;  %s1687_s5 = sld [smem:[#allocation7 + $0x36]] }
 0x198   : > { %v861_v33 = vsel %vm387_vm11, %v859_v24, %v860_v30  ;;  %v1167_v34 = vsel %vm376_vm10, %v1165_v25, %v1166_v31 }
 0x199   : > { %v863_v35 = vadd.f32 %v861_v33, %v853_v59  ;;  %v1169_v27 = vadd.f32 %v1167_v34, %v1159_v22  ;;  %v1013_v36 = vpop.permute.xlu1 %1012  ;;  %v869_v37 = vpop.permute.xlu0 %868  ;;  %v885_v9 = vstv %s1659_s20  ;;  %s1506_s20 = sshll.u32 %s213_s7, 4  ;;  %s2632_s20 = int_to_ptr.vmem [resolvable:$true] %s1506_s20 }
 0x19a   : > { %v1014_v39 = vrot.slane %v1013_v36, 1  ;;  %v870_v40 = vrot.slane %v869_v37, 1  ;;  %v886_v18 = vmul.f32 %v885_v9, %v2220_v3  ;;  %p1876_p7 = scmp.lt.s32.totalorder %s2632_s20, %s1874_s24 }
 0x19b   : > { %473 = vrot.lane.b32.xlu1 %v471_v38, %s1956_s25  ;;  %s1957_s25 = smov 127  }
 0x19c   : > { %v1015_v41 = vsel %vm387_vm11, %v1013_v36, %v1014_v39  ;;  %v871_v42 = vsel %vm398_vm12, %v869_v37, %v870_v40  ;;  %v1361_v40 = vstv %s1701_s18 }
 0x19d   : > { %v1017_v43 = vadd.f32 %v1015_v41, %v1007_v60  ;;  %v873_v44 = vadd.f32 %v871_v42, %v863_v35  ;;  %v1315_v45 = vpop.permute.xlu1 %1314  ;;  %v1023_v46 = vpop.permute.xlu0 %1022  ;;  %v1201_v31 = vstv %s1687_s5 }
 0x19e   : > { %v1316_v47 = vrot.slane %v1315_v45, 1  ;;  %v1024_v48 = vrot.slane %v1023_v46, 1  ;;  %v1202_v38 = vmul.f32 %v1201_v31, %v2220_v3 }
 0x1a0   : > { %v1317_v51 = vsel %vm365_vm9, %v1315_v45, %v1316_v47  ;;  %v1025_v52 = vsel %vm398_vm12, %v1023_v46, %v1024_v48  ;;  %v1362_v46 = vmul.f32 %v1361_v40, %v2220_v3 }
 0x1a1   : > { %v1319_v55 = vadd.f32 %v1317_v51, %v1309_v10  ;;  %v1027_v57 = vadd.f32 %v1025_v52, %v1017_v43  ;;  %v1175_v58 = vpop.permute.xlu1 %1174  ;;  %v1325_v59 = vpop.permute.xlu0 %1324 }
 0x1a2   : > { %v1176_v61 = vrot.slane %v1175_v58, 1  ;;  %v1326_v63 = vrot.slane %v1325_v59, 1 }
 0x1a4   : > { %v1177_v0 = vsel %vm387_vm11, %v1175_v58, %v1176_v61  ;;  %v1327_v60 = vsel %vm376_vm10, %v1325_v59, %v1326_v63 }
 0x1a5   : > { %v1179_v2 = vadd.f32 %v1177_v0, %v1169_v27  ;;  %v1329_v4 = vadd.f32 %v1327_v60, %v1319_v55  ;;  %v879_v5 = vpop.permute.xlu1 %878  ;;  %v1033_v6 = vpop.permute.xlu0 %1032 }
 0x1a6   : > { %v880_v7 = vrot.slane %v879_v5, 1  ;;  %v1034_v8 = vrot.slane %v1033_v6, 1 }
 0x1a8   : > { %v881_v10 = vsel %vm409_vm13, %v879_v5, %v880_v7  ;;  %v1035_v11 = vsel %vm409_vm13, %v1033_v6, %v1034_v8 }
 0x1a9   : > { %v883_v12 = vadd.f32 %v881_v10, %v873_v44  ;;  %v1037_v13 = vadd.f32 %v1035_v11, %v1027_v57  ;;  %v1185_v15 = vpop.permute.xlu1 %1184  ;;  %v1335_v16 = vpop.permute.xlu0 %1334 }
 0x1aa   : > { %v1186_v54 = vrot.slane %v1185_v15, 1  ;;  %v1336_v19 = vrot.slane %v1335_v16, 1 }
 0x1ab   : > { %v2462_v20 = vadd.f32 %v1040_v17, %v1037_v13  ;;  %v2464_v21 = vadd.f32 %v886_v18, %v883_v12 }
 0x1ac   : > { %v1187_v22 = vsel %vm398_vm12, %v1185_v15, %v1186_v54  ;;  %v1337_v23 = vsel %vm387_vm11, %v1335_v16, %v1336_v19 }
 0x1ad   : > { %v1339_v24 = vadd.f32 %v1337_v23, %v1329_v4  ;;  %v1195_v25 = vpop.permute.xlu1 %1194  ;;  %v1345_v26 = vpop.permute.xlu0 %1344  ;;  %v1189_v14 = vadd.f32 %v1187_v22, %v1179_v2  ;;  %v2493_v22 = vsub.s32 0, %v2140_v28  ;;  %v2496_v23 = vsub.s32 1, %v2140_v28 }
 0x1ae   : > { %v1196_v29 = vrot.slane %v1195_v25, 1  ;;  %v1346_v30 = vrot.slane %v1345_v26, 1 }
 0x1b0   : > { %v1197_v33 = vsel %vm409_vm13, %v1195_v25, %v1196_v29  ;;  %v1347_v34 = vsel %vm398_vm12, %v1345_v26, %v1346_v30 }
 0x1b1   : > { %v1199_v35 = vadd.f32 %v1197_v33, %v1189_v14  ;;  %v1349_v27 = vadd.f32 %v1347_v34, %v1339_v24  ;;  %v1355_v36 = vpop.permute.xlu1 %1354  ;;  %v583_v37 = vpop.permute.xlu0 %582 }
 0x1b2   : > { %v1356_v39 = vrot.slane %v1355_v36, 1  ;;  %v584_v63 = vrot.slane %v583_v37, 1 }
 0x1b3   : > { %v2471_v41 = vadd.f32 %v1202_v38, %v1199_v35 }
 0x1b4   : > { %v1357_v42 = vsel %vm409_vm13, %v1355_v36, %v1356_v39  ;;  %v585_v3 = vsel %vm365_vm9, %v583_v37, %v584_v63  ;;  %v2507_v36 = vsub.s32 2, %v2140_v28 }
 0x1b5   : > { %v1359_v43 = vadd.f32 %v1357_v42, %v1349_v27  ;;  %v573_v44 = vpop.permute.xlu1 %572  ;;  %v743_v45 = vpop.permute.xlu0 %742 }
 0x1b6   : > { %v574_v52 = vrot.slane %v573_v44, 1  ;;  %v744_v18 = vrot.slane %v743_v45, 1 }
 0x1b7   : > { %v2475_v47 = vadd.f32 %v1362_v46, %v1359_v43 }
 0x1b8   : > { %v575_v58 = vsel %vm354_vm8, %v573_v44, %v574_v52  ;;  %v745_v14 = vsel %vm365_vm9, %v743_v45, %v744_v18 }
 0x1b9   : > { %v733_v48 = vpop.permute.xlu1 %732  ;;  %v603_v51 = vpop.permute.xlu0 %602  ;;  %v577_v60 = vadd.f32 %v575_v58, %v2415_v53 }
 0x1ba   : > { %v734_v7 = vrot.slane %v733_v48, 1  ;;  %v604_v8 = vrot.slane %v603_v51, 1 }
 0x1bb   : > { %v587_v6 = vadd.f32 %v585_v3, %v577_v60 }
 0x1bc   : > { %v735_v12 = vsel %vm354_vm8, %v733_v48, %v734_v7  ;;  %v605_v13 = vsel %vm387_vm11, %v603_v51, %v604_v8 }
 0x1bd   : > { %v593_v55 = vpop.permute.xlu1 %592  ;;  %v2477_v57 = vpop.permute.xlu0 %1046  ;;  %v737_v24 = vadd.f32 %v735_v12, %v2446_v32 }
 0x1be   : > { %v594_v0 = vrot.slane %v593_v55, 1 }
 0x1bf   : > { %v747_v34 = vadd.f32 %v745_v14, %v737_v24 }
 0x1c0   : > { %v595_v5 = vsel %vm376_vm10, %v593_v55, %v594_v0 }
 0x1c1   : > { %v893_v59 = vpop.permute.xlu1 %892  ;;  %v2480_v61 = vpop.permute.xlu0 %902  ;;  %v597_v62 = vadd.f32 %v595_v5, %v587_v6 }
 0x1c2   : > { %v894_v48 = vrot.slane %v893_v59, 1  ;;  %v904_v3 = vrot.slane %v2480_v61, 1 }
 0x1c3   : > { %v607_v15 = vadd.f32 %v605_v13, %v597_v62 }
 0x1c4   : > { %v895_v60 = vsel %vm354_vm8, %v893_v59, %v894_v48  ;;  %v905_v59 = vsel %vm365_vm9, %v2480_v61, %v904_v3 }
 0x1c5   : > { %v753_v2 = vpop.permute.xlu1 %752  ;;  %v763_v4 = vpop.permute.xlu0 %762  ;;  %v897_v6 = vadd.f32 %v895_v60, %v2464_v21 }
 0x1c6   : > { %v754_v54 = vrot.slane %v753_v2, 1  ;;  %v764_v32 = vrot.slane %v763_v4, 1 }
 0x1c8   : > { %v755_v33 = vsel %vm376_vm10, %v753_v2, %v754_v54  ;;  %v765_v43 = vsel %vm387_vm11, %v763_v4, %v764_v32 }
 0x1c9   : > { %v613_v9 = vpop.permute.xlu1 %612  ;;  %v2485_v10 = vpop.permute.xlu0 %1208  ;;  %v757_v37 = vadd.f32 %v755_v33, %v747_v34 }
 0x1ca   : > { %v614_v11 = vrot.slane %v613_v9, 1 }
 0x1cb   : > { %v767_v45 = vadd.f32 %v765_v43, %v757_v37 }
 0x1cc   : > { %v615_v53 = vsel %vm398_vm12, %v613_v9, %v614_v11  ;;  %v1048_v9 = vrot.slane %v2477_v57, 1 }
 0x1cd   : > { %v2490_v16 = vpop.permute.xlu1 %1056  ;;  %v623_v17 = vpop.permute.xlu0 %622  ;;  %v617_v25 = vadd.f32 %v615_v53, %v607_v15  ;;  %v907_v53 = vadd.f32 %v905_v59, %v897_v6 }
 0x1ce   : > { %v624_v19 = vrot.slane %v623_v17, 1  ;;  %v1058_v15 = vrot.slane %v2490_v16, 1  ;;  %v1049_v54 = vsel %vm354_vm8, %v2477_v57, %v1048_v9 }
 0x1cf   : > { %v1051_v34 = vadd.f32 %v1049_v54, %v2462_v20 }
 0x1d0   : > { %v625_v26 = vsel %vm409_vm13, %v623_v17, %v624_v19  ;;  %v1210_v19 = vrot.slane %v2485_v10, 1 }
 0x1d1   : > { %v627_v29 = vadd.f32 %v625_v26, %v617_v25  ;;  %v913_v30 = vpop.permute.xlu1 %912  ;;  %v2500_v31 = vpop.permute.xlu0 %1066  ;;  %v1059_v26 = vsel %vm365_vm9, %v2490_v16, %v1058_v15 }
 0x1d2   : > { %v914_v5 = vrot.slane %v913_v30, 1  ;;  %v1068_v25 = vrot.slane %v2500_v31, 1  ;;  %v1211_v57 = vsel %vm354_vm8, %v2485_v10, %v1210_v19 }
 0x1d3   : > { %v640_v35 = vrot.slane %v627_v29, %v2496_v23  ;;  %v636_v27 = vrot.slane %v627_v29, %v2493_v22  ;;  %v644_v42 = vrot.slane %v627_v29, %v2507_v36 }
 0x1d4   : > { %v915_v12 = vsel %vm376_vm10, %v913_v30, %v914_v5  ;;  %v1069_v32 = vsel %vm376_vm10, %v2500_v31, %v1068_v25 }
 0x1d5   : > { %v773_v38 = vpop.permute.xlu1 %772  ;;  %647 = vrot.lane.b32.xlu1 %v640_v35, %s1957_s25  ;;  %645 = vrot.lane.b32.xlu0 %v636_v27, %s1957_s25  ;;  %v2509_v39 = vpop.permute.xlu0 %1368  ;;  %v917_v24 = vadd.f32 %v915_v12, %v907_v53 }
 0x1d6   : > { %v774_v40 = vrot.slane %v773_v38, 1  ;;  %v1370_v43 = vrot.slane %v2509_v39, 1 }
 0x1d8   : > { %v775_v44 = vsel %vm398_vm12, %v773_v38, %v774_v40  ;;  %v1061_v40 = vadd.f32 %v1059_v26, %v1051_v34 }
 0x1d9   : > { %v1219_v46 = vpop.permute.xlu1 %1218  ;;  %649 = vrot.lane.b32.xlu0 %v644_v42, %s1957_s25  ;;  %v783_v28 = vpop.permute.xlu0 %782  ;;  %v777_v52 = vadd.f32 %v775_v44, %v767_v45  ;;  %s2630_s25 = scalar_lea.hbm %s2677_s3, %s1717_s10 }
 0x1da   : > { %v784_v51 = vrot.slane %v783_v28, 1  ;;  %v1220_v29 = vrot.slane %v1219_v46, 1  ;;  %v1071_v10 = vadd.f32 %v1069_v32, %v1061_v40 }
 0x1dc   : > { %v785_v55 = vsel %vm409_vm13, %v783_v28, %v784_v51  ;;  %v1221_v44 = vsel %vm365_vm9, %v1219_v46, %v1220_v29  ;;  %v1213_v51 = vadd.f32 %v1211_v57, %v2471_v41 }
 0x1dd   : > { %v787_v58 = vadd.f32 %v785_v55, %v777_v52  ;;  %v923_v63 = vpop.permute.xlu1 %922  ;;  %v1229_v0 = vpop.permute.xlu0 %1228 }
 0x1de   : > { %v924_v62 = vrot.slane %v923_v63, 1  ;;  %v1230_v37 = vrot.slane %v1229_v0, 1  ;;  %v1223_v60 = vadd.f32 %v1221_v44, %v1213_v51  ;;  %v364_v51 = vrot.slane %v2284_v56, 1 }
 0x1df   : > { %v800_v2 = vrot.slane %v787_v58, %v2496_v23  ;;  %v796_v4 = vrot.slane %v787_v58, %v2493_v22  ;;  %v804_v11 = vrot.slane %v787_v58, %v2507_v36 }
 0x1e0   : > { %v925_v18 = vsel %vm387_vm11, %v923_v63, %v924_v62  ;;  %v1231_v31 = vsel %vm376_vm10, %v1229_v0, %v1230_v37 }
 0x1e1   : > { %v1077_v7 = vpop.permute.xlu1 %1076  ;;  %807 = vrot.lane.b32.xlu0 %v800_v2, %s1958_s11  ;;  %805 = vrot.lane.b32.xlu1 %v796_v4, %s1958_s11  ;;  %v933_v8 = vpop.permute.xlu0 %932  ;;  %v927_v30 = vadd.f32 %v925_v18, %v917_v24  ;;  %v1371_v4 = vsel %vm354_vm8, %v2509_v39, %v1370_v43  ;;  %v1233_v6 = vadd.f32 %v1231_v31, %v1223_v60 }
 0x1e2   : > { %v934_v13 = vrot.slane %v933_v8, 1  ;;  %v1078_v35 = vrot.slane %v1077_v7, 1  ;;  %v1373_v53 = vadd.f32 %v1371_v4, %v2475_v47 }
 0x1e4   : > { %v935_v61 = vsel %vm398_vm12, %v933_v8, %v934_v13  ;;  %v1079_v52 = vsel %vm387_vm11, %v1077_v7, %v1078_v35 }
 0x1e5   : > { %v1379_v21 = vpop.permute.xlu1 %1378  ;;  %809 = vrot.lane.b32.xlu1 %v804_v11, %s1958_s11  ;;  %v1239_v17 = vpop.permute.xlu0 %1238  ;;  %v937_v38 = vadd.f32 %v935_v61, %v927_v30  ;;  %v1081_v3 = vadd.f32 %v1079_v52, %v1071_v10  ;;  %s1492_s11 = scalar_lea.sflag [#allocation5], %s2109_s21 }
 0x1e6   : > { %v1240_v45 = vrot.slane %v1239_v17, 1  ;;  %v1380_v2 = vrot.slane %v1379_v21, 1 }
 0x1e8   : > { %v1241_v41 = vsel %vm387_vm11, %v1239_v17, %v1240_v45  ;;  %v1381_v12 = vsel %vm365_vm9, %v1379_v21, %v1380_v2 }
 0x1e9   : > { %v1087_v14 = vpop.permute.xlu1 %1086  ;;  %v943_v33 = vpop.permute.xlu0 %942  ;;  %v1243_v39 = vadd.f32 %v1241_v41, %v1233_v6  ;;  %v1383_v25 = vadd.f32 %v1381_v12, %v1373_v53 }
 0x1ea   : > { %v944_v27 = vrot.slane %v943_v33, 1  ;;  %v1088_v42 = vrot.slane %v1087_v14, 1 }
 0x1ec   : > { %v945_v16 = vsel %vm409_vm13, %v943_v33, %v944_v27  ;;  %v1089_v46 = vsel %vm398_vm12, %v1087_v14, %v1088_v42 }
 0x1ed   : > { %v947_v20 = vadd.f32 %v945_v16, %v937_v38  ;;  %v1389_v28 = vpop.permute.xlu1 %1388  ;;  %v1249_v48 = vpop.permute.xlu0 %1248  ;;  %v1091_v9 = vadd.f32 %v1089_v46, %v1081_v3 }
 0x1ee   : > { %v1250_v55 = vrot.slane %v1249_v48, 1  ;;  %v1390_v7 = vrot.slane %v1389_v28, 1 }
 0x1ef   : > { %v956_v58 = vrot.slane %v947_v20, %v2496_v23  ;;  %v952_v63 = vrot.slane %v947_v20, %v2493_v22  ;;  %v960_v59 = vrot.slane %v947_v20, %v2507_v36  ;;  %v353_v20 = vrot.slane %v2268_v49, 1 }
 0x1f0   : > { %v1251_v11 = vsel %vm398_vm12, %v1249_v48, %v1250_v55  ;;  %v1391_v54 = vsel %vm376_vm10, %v1389_v28, %v1390_v7  ;;  %v343_v28 = vstv %s341_s26  ;;  %v342_v48 = vld [vmem:[#allocation2] sm:$0x3]  ;;  %v366_v55 = vsel %vm365_vm9, %v2284_v56, %v364_v51 }
 0x1f1   : > { %v1097_v5 = vpop.permute.xlu1 %1096  ;;  %963 = vrot.lane.b32.xlu1 %v956_v58, %s1959_s17  ;;  %961 = vrot.lane.b32.xlu0 %v952_v63, %s1959_s17  ;;  %v1259_v0 = vpop.permute.xlu0 %1258  ;;  %v1253_v19 = vadd.f32 %v1251_v11, %v1243_v39  ;;  %v1393_v14 = vadd.f32 %v1391_v54, %v1383_v25  ;;  %v355_v10 = vsel %vm354_vm8, %v2268_v49, %v353_v20  ;;  %v375_v63 = vrot.slane %v2270_v50, 1  ;;  %v414_v11 = vld [vmem:[#allocation2 + $0x3] sm:$0x3] }
 0x1f2   : > { %v1098_v8 = vrot.slane %v1097_v5, 1  ;;  %v1260_v62 = vrot.slane %v1259_v0, 1  ;;  %v344_v52 = vmul.f32 %v343_v28, %v342_v48 }
 0x1f3   : > { %v377_v46 = vsel %vm376_vm10, %v2270_v50, %v375_v63 }
 0x1f4   : > { %v1099_v13 = vsel %vm409_vm13, %v1097_v5, %v1098_v8  ;;  %v1261_v17 = vsel %vm409_vm13, %v1259_v0, %v1260_v62  ;;  %v357_v58 = vadd.f32 %v355_v10, %v344_v52 }
 0x1f5   : > { %v1101_v15 = vadd.f32 %v1099_v13, %v1091_v9  ;;  %v1399_v18 = vpop.permute.xlu1 %1398  ;;  %965 = vrot.lane.b32.xlu0 %v960_v59, %s1959_s17  ;;  %v1419_v61 = vpop.permute.xlu0 %1418  ;;  %v1263_v29 = vadd.f32 %v1261_v17, %v1253_v19  ;;  %v415_v9 = vstv %s1617_s27  ;;  %s1869_s17 = scalar_lea.vmem %s2632_s20, 128 }
 0x1f6   : > { %v1400_v24 = vrot.slane %v1399_v18, 1  ;;  %v1420_v33 = vrot.slane %v1419_v61, 1  ;;  %v368_v60 = vadd.f32 %v366_v55, %v357_v58  ;;  %v416_v50 = vmul.f32 %v415_v9, %v414_v11  ;;  %p1870_p6 = scmp.ne.s32.totalorder %s2632_s20, %s1869_s17 }
 0x1f7   : > { %v1112_v26 = vrot.slane %v1101_v15, %v2493_v22  ;;  %v1116_v30 = vrot.slane %v1101_v15, %v2496_v23  ;;  %v1120_v27 = vrot.slane %v1101_v15, %v2507_v36  ;;  %v1272_v57 = vrot.slane %v1263_v29, %v2493_v22 }
 0x1f8   : > { %v1401_v21 = vsel %vm387_vm11, %v1399_v18, %v1400_v24  ;;  %v1421_v38 = vsel %vm409_vm13, %v1419_v61, %v1420_v33  ;;  %v1276_v40 = vrot.slane %v1263_v29, %v2496_v23  ;;  %v1280_v16 = vrot.slane %v1263_v29, %v2507_v36  ;;  %p1871_p13 = pnand %p1870_p6, %p2063_p8 }
 0x1f9   : > { %v1409_v47 = vpop.permute.xlu1 %1408  ;;  %1121 = vrot.lane.b32.xlu1 %v1112_v26, %s1960_s29  ;;  %1123 = vrot.lane.b32.xlu0 %v1116_v30, %s1960_s29  ;;  %v1403_v35 = vadd.f32 %v1401_v21, %v1393_v14  ;;  %v396_v2 = vpop.permute.xlu0 %395  ;;  %v379_v3 = vadd.f32 %v377_v46, %v368_v60 }
 0x1fa   : > { %v1410_v34 = vrot.slane %v1409_v47, 1  ;;  %v397_v5 = vrot.slane %v396_v2, 1  ;;  %p1872_p3 = pneg %p1871_p13 }
 0x1fc   : > { %v1411_v32 = vsel %vm398_vm12, %v1409_v47, %v1410_v34  ;;  %v399_v56 = vsel %vm398_vm12, %v396_v2, %v397_v5 }
 0x1fd   : > { %v1413_v37 = vadd.f32 %v1411_v32, %v1403_v35  ;;  %1125 = vrot.lane.b32.xlu1 %v1120_v27, %s1960_s29  ;;  %1281 = vrot.lane.b32.xlu0 %v1272_v57, %s1961_s23  ;;  %v385_v31 = vpop.permute.xlu1 %384  ;;  %v424_v0 = vpop.permute.xlu0 %423 }
 0x1fe   : > { %v425_v39 = vrot.slane %v424_v0, 1 }
 0x1ff   : > { %v1423_v42 = vadd.f32 %v1421_v38, %v1413_v37  ;;  %v315_v38 = vand.u32 127, %v253_v1 }
 0x200   : > { %v426_v17 = vsel %vm354_vm8, %v424_v0, %v425_v39 }
 0x201   : > { %1283 = vrot.lane.b32.xlu1 %v1276_v40, %s1961_s23  ;;  %1285 = vrot.lane.b32.xlu0 %v1280_v16, %s1961_s23  ;;  %v1432_v43 = vrot.slane %v1423_v42, %v2493_v22  ;;  %v1436_v44 = vrot.slane %v1423_v42, %v2496_v23  ;;  %v1440_v45 = vrot.slane %v1423_v42, %v2507_v36  ;;  %v386_v36 = vrot.slane %v385_v31, 1  ;;  %v407_v41 = vpop.permute.xlu1 %406  ;;  %v444_v59 = vpop.permute.xlu0 %443 }
 0x202   : > { %v408_v6 = vrot.slane %v407_v41, 1  ;;  %v445_v25 = vrot.slane %v444_v59, 1  ;;  %v321_v48 = vand.u32 15, %v315_v38 }
 0x203   : > { %v388_v4 = vsel %vm387_vm11, %v385_v31, %v386_v36 }
 0x204   : > { %v390_v49 = vadd.f32 %v388_v4, %v379_v3  ;;  %v410_v8 = vsel %vm409_vm13, %v407_v41, %v408_v6  ;;  %v446_v21 = vsel %vm376_vm10, %v444_v59, %v445_v25  ;;  %vm628_vm0 = vcmp.ge.s32.totalorder %v321_v48, 2 }
 0x205   : > { %1441 = vrot.lane.b32.xlu1 %v1432_v43, %s1962_s22  ;;  %1443 = vrot.lane.b32.xlu0 %v1436_v44, %s1962_s22  ;;  %v434_v62 = vpop.permute.xlu1 %433  ;;  %v464_v15 = vpop.permute.xlu0 %463  ;;  %v316_v44 = vadd.s32 128, %v315_v38  ;;  %vm479_vm1 = vcmp.ge.s32.totalorder %v321_v48, 3  ;;  %vm788_vm2 = vcmp.ge.s32.totalorder %v321_v48, 1  ;;  %vm1104_vm8 = vcmp.lt.s32.totalorder %v321_v48, 15 }
 0x206   : > { %v401_v7 = vadd.f32 %v399_v56, %v390_v49  ;;  %v435_v18 = vrot.slane %v434_v62, 1  ;;  %v465_v34 = vrot.slane %v464_v15, 1 }
 0x207   : > { %v2589_v10 = vand.u32 15, %v316_v44 }
 0x208   : > { %v412_v12 = vadd.f32 %v410_v8, %v401_v7  ;;  %v436_v61 = vsel %vm365_vm9, %v434_v62, %v435_v18  ;;  %v466_v32 = vsel %vm398_vm12, %v464_v15, %v465_v34  ;;  %vm1287_vm9 = vcmask 1006592  }
 0x209   : > { %1445 = vrot.lane.b32.xlu1 %v1440_v45, %s1962_s22  ;;  %v454_v13 = vpop.permute.xlu1 %453  ;;  %vm629_vm3 = vcmp.ge.s32.totalorder %v2589_v10, 2  ;;  %vm480_vm5 = vcmp.ge.s32.totalorder %v2589_v10, 3  ;;  %vm789_vm6 = vcmp.ge.s32.totalorder %v2589_v10, 1  ;;  %vm1105_vm10 = vcmp.lt.s32.totalorder %v2589_v10, 15 }
 0x20a   : > { %v417_v53 = vadd.f32 %v416_v50, %v412_v12  ;;  %v455_v30 = vrot.slane %v454_v13, 1  ;;  %vm1265_vm12 = vcmp.lt.s32.totalorder %v2589_v10, 14 }
 0x20c   : > { %v428_v54 = vadd.f32 %v426_v17, %v417_v53  ;;  %v456_v35 = vsel %vm387_vm11, %v454_v13, %v455_v30  ;;  %vm1264_vm11 = vcmp.lt.s32.totalorder %v321_v48, 14 }
 0x20d   : > { %v474_v19 = vpop.permute.xlu1 %473 }
 0x20e   : > { %v438_v26 = vadd.f32 %v436_v61, %v428_v54  ;;  %v475_v37 = vrot.slane %v474_v19, 1 }
 0x210   : > { %v448_v47 = vadd.f32 %v446_v21, %v438_v26  ;;  %v476_v43 = vsel %vm409_vm13, %v474_v19, %v475_v37  ;;  %vm1447_vm13 = vcmask 998400  }
 0x212   : > { %v458_v57 = vadd.f32 %v456_v35, %v448_v47 }
 0x214   : > { %v468_v16 = vadd.f32 %v466_v32, %v458_v57 }
 0x216   : > { %v478_v28 = vadd.f32 %v476_v43, %v468_v16 }
 0x218   : > { %v489_v31 = vrot.slane %v478_v28, %v2493_v22  ;;  %v493_v36 = vrot.slane %v478_v28, %v2496_v23 }
 0x21a   : > { %v496_v2 = vsel %vm479_vm1, %v489_v31, 0.0  ;;  %v497_v23 = vsel %vm480_vm5, %v493_v36, 0.0 }
 0x247   : > { %v646_v24 = vpop.permute.xlu0 %645  ;;  %v648_v29 = vpop.permute.xlu1 %647 }
 0x248   : > { %v652_v51 = vsel %vm651_vm14, %v646_v24, %v648_v29 }
 0x249   : > { %v656_v58 = vsel %vm628_vm0, %v652_v51, 0.0 }
 0x24a   : > { %v658_v41 = vadd.f32 %v656_v58, %v496_v2 }
 0x24b   : > { %v650_v14 = vpop.permute.xlu0 %649 }
 0x24c   : > { %v653_v63 = vsel %vm651_vm14, %v648_v29, %v650_v14  ;;  %vm1424_vm14 = vcmp.lt.s32.totalorder %v321_v48, 13  ;;  %v1457_v29 = vstv %s2601_s4 }
 0x24d   : > { %v657_v5 = vsel %vm629_vm3, %v653_v63, 0.0 }
 0x24e   : > { %v659_v8 = vadd.f32 %v657_v5, %v497_v23 }
 0x253   : > { %v806_v33 = vpop.permute.xlu1 %805  ;;  %v808_v27 = vpop.permute.xlu0 %807 }
 0x254   : > { %v812_v55 = vsel %vm811_vm15, %v806_v33, %v808_v27  ;;  %v1461_v33 = vstv %s2609_s6 }
 0x255   : > { %v816_v46 = vsel %vm788_vm2, %v812_v55, 0.0 }
 0x256   : > { %v818_v6 = vadd.f32 %v816_v46, %v658_v41 }
 0x257   : > { %v810_v40 = vpop.permute.xlu1 %809 }
 0x258   : > { %v813_v4 = vsel %vm811_vm15, %v808_v27, %v810_v40  ;;  %vm1425_vm15 = vcmp.lt.s32.totalorder %v2589_v10, 13  ;;  %v1476_v10 = vld [vmem:[%s2115_s30] sm:$0xff]  ;;  %s1875_s30 = scalar_lea.vmem %s1874_s24, 256 }
 0x259   : > { %v817_v56 = vsel %vm789_vm6, %v813_v4, 0.0  ;;  %p1877_p12 = scmp.lt.s32.totalorder %s1875_s30, %s1869_s17 }
 0x25a   : > { %v819_v39 = vadd.f32 %v817_v56, %v659_v8 }
 0x25b   : > { %p1878_p0 = por %p1877_p12, %p1876_p7 }
 0x25d   : > { %p1879_p2 = pnand %p1878_p0, %p1872_p3 }
 0x263   : > { %v962_v42 = vpop.permute.xlu0 %961  ;;  %v964_v45 = vpop.permute.xlu1 %963 }
 0x264   : > { %v968_v0 = vsel %vm967_vm7, %v962_v42, %v964_v45 }
 0x265   : > { %v972_v12 = vadd.f32 %v968_v0, %v818_v6 }
 0x267   : > { %v966_v20 = vpop.permute.xlu0 %965 }
 0x268   : > { %v969_v50 = vsel %vm967_vm7, %v964_v45, %v966_v20 }
 0x269   : > { %v973_v54 = vadd.f32 %v969_v50, %v819_v39 }
 0x26b   : > { %v1122_v52 = vpop.permute.xlu1 %1121  ;;  %v1124_v1 = vpop.permute.xlu0 %1123 }
 0x26c   : > { %v1128_v49 = vsel %vm1127_vm4, %v1122_v52, %v1124_v1 }
 0x26d   : > { %v1132_v62 = vsel %vm1104_vm8, %v1128_v49, 0.0 }
 0x26e   : > { %v1134_v15 = vadd.f32 %v1132_v62, %v972_v12 }
 0x26f   : > { %v1126_v60 = vpop.permute.xlu1 %1125  ;;  %v1282_v3 = vpop.permute.xlu0 %1281 }
 0x270   : > { %v1129_v9 = vsel %vm1127_vm4, %v1124_v1, %v1126_v60 }
 0x271   : > { %v1133_v17 = vsel %vm1105_vm10, %v1129_v9, 0.0 }
 0x272   : > { %v1135_v26 = vadd.f32 %v1133_v17, %v973_v54 }
 0x273   : > { %v1284_v7 = vpop.permute.xlu1 %1283  ;;  %v1286_v59 = vpop.permute.xlu0 %1285 }
 0x274   : > { %v1288_v11 = vsel %vm1287_vm9, %v1282_v3, %v1284_v7  ;;  %v1289_v53 = vsel %vm1287_vm9, %v1284_v7, %v1286_v59 }
 0x275   : > { %v1292_v13 = vsel %vm1264_vm11, %v1288_v11, 0.0  ;;  %v1293_v25 = vsel %vm1265_vm12, %v1289_v53, 0.0 }
 0x276   : > { %v1294_v24 = vadd.f32 %v1292_v13, %v1134_v15  ;;  %v1295_v47 = vadd.f32 %v1293_v25, %v1135_v26 }
 0x277   : > { %v1442_v18 = vpop.permute.xlu1 %1441  ;;  %v1444_v19 = vpop.permute.xlu0 %1443 }
 0x278   : > { %v1448_v61 = vsel %vm1447_vm13, %v1442_v18, %v1444_v19 }
 0x279   : > { %v1452_v21 = vsel %vm1424_vm14, %v1448_v61, 0.0 }
 0x27a   : > { %v1454_v30 = vadd.f32 %v1452_v21, %v1294_v24 }
 0x27b   : > { %v1446_v14 = vpop.permute.xlu1 %1445 }
 0x27c   : > { %v1449_v34 = vsel %vm1447_vm13, %v1444_v19, %v1446_v14  ;;  %v1458_v35 = vmul.f32 %v1457_v29, %v1454_v30 }
 0x27d   : > { %v1453_v27 = vsel %vm1425_vm15, %v1449_v34, 0.0 }
 0x27e   : > { %v1455_v57 = vadd.f32 %v1453_v27, %v1295_v47  ;;  %v1462_v32 = vadd.f32 %v1461_v33, %v1458_v35 }
 0x280   : > { %v1459_v37 = vmul.f32 %v1457_v29, %v1455_v57  ;;  %v1709_v38 = vmul.f32 -1.442695, %v1462_v32 }
 0x282   : > { %v1463_v40 = vadd.f32 %v1461_v33, %v1459_v37  ;;  %1801 = vpow2.f32 %v1709_v38 }
 0x284   : > { %v1710_v42 = vmul.f32 -1.442695, %v1463_v40 }
 0x286   : > { %1803 = vpow2.f32 %v1710_v42 }
 0x28c   : > { %v1802_v16 = vpop.eup %1801 }
 0x28d   : > { %v1470_v43 = vadd.f32 1.0, %v1802_v16 }
 0x28f   : > { %1805 = vrcp.f32 %v1470_v43 }
 0x290   : > { %v1804_v44 = vpop.eup %1803 }
 0x291   : > { %v1471_v45 = vadd.f32 1.0, %v1804_v44 }
 0x293   : > { %1807 = vrcp.f32 %v1471_v45 }
 0x299   : > { %v1806_v20 = vpop.eup %1805 }
 0x29a   : > { %v1480_v48 = vrot.slane %v1806_v20, %v2493_v22 }
 0x29d   : > { %v1808_v28 = vpop.eup %1807 }
 0x29e   : > { %v1484_v51 = vrot.slane %v1808_v28, %v2493_v22 }
 0x2a0   : > { %v1487_v52 = vcombine.low %v1480_v48, %v1484_v51 }
 0x2a2   : > { %v1489_v31 = vmul.f32 %v1487_v52, %v1476_v10 }
 0x2a4   : > { %1490 = vst [vmem:[%s213_s7] sm:$0xff] %v1489_v31 }
 0x2a5   : > { %1882 = shalt.err (!%p1879_p2)
}
 0x2a6   : > { %s1883_s21 = scalar_lea.hbm %s2630_s25, 128  ;;  %s1887_s22 = scalar_lea.hbm %s2677_s3, 256 }
 0x2a7   : > { %p1884_p10 = scmp.ne.s32.totalorder %s2630_s25, %s1883_s21  ;;  %p1888_p1 = scmp.lt.u32.totalorder %s2630_s25, %s2677_s3 }
 0x2a8   : > { %p1889_p9 = scmp.lt.u32.totalorder %s1887_s22, %s1883_s21  ;;  %p1891_p6 = scmp.lt.u32.totalorder %s1883_s21, %s2630_s25 }
 0x2a9   : > { %p1885_p5 = pnand %p1884_p10, %p2063_p8 }
 0x2aa   : > { %p1890_p4 = por %p1889_p9, %p1888_p1 }
 0x2ab   : > { %p1886_p11 = pneg %p1885_p5 }
 0x2ac   : > { %p1892_p13 = por %p1891_p6, %p1890_p4 }
 0x2ae   : > { %p1893_p3 = pnand %p1892_p13, %p1886_p11 }
 0x2b0   : > { %1896 = shalt.err (!%p1893_p3)
}
 0x2b1   : > { %1728 = dma.vmem_to_hbm [thread:$0]  (%p2063_p8), %s2632_s20, 128, %s2630_s25, %s1492_s11  }
 0x2b2 PF: > { %s1518_s4 = sand.u32 1, %s1931_s12   ;;  %p2696_p7 = scmp.ne.s32.totalorder %s2682_s19, 0 }
 0x2b3   : > { %p2697_p12 = scmp.ge.s32.totalorder %s1943_s15, 2  ;;  %s1519_s6 = scalar_lea.sflag [#allocation5], %s1518_s4 }
 0x2b5   : > { %p1742_p0 = pnand %p2697_p12, %p2696_p7 }
 0x2b7   : > { %1926 = dma.done.wait (!%p1742_p0), %s1519_s6, 128  }
 0x2b8   : > { %1928 = vsyncadd (!%p1742_p0), %s1519_s6, 4294967168  ;;  %p18_p2 = scmp.ge.s32.totalorder %s2044_s28, 4   ;;  %s2698_s12 = smov %s1935_s13 }
 0x2b9   : > { %s2699_s13 = smov %s1939_s14  ;;  %s2700_s14 = smov %s2059_s8 }
 0x2ba   : > { %s2701_s15 = smov %s2044_s28  ;;  %20 = sbr.rel (!%p18_p2) target bundleno = 7 (0x7), region = 87 }
 0x2c1   :  { %1524 = vsyncpa [#allocation4], 1 }
 0x2c2   :  { %1526 = vsyncpa [#allocation4 + $0x1], 1 }
 0x2c3   :  { %1527 = vsyncpa [#allocation5], 1 }
 0x2c4   :  { %1529 = vsyncpa [#allocation5 + $0x1], 1 }
 0x2c5   :  { %1530 = vsyncpa [#allocation6], 1 }
 0x2c6   :  { %1532 = vsyncpa [#allocation6 + $0x1], 1 }
 0x2c7   :  { %1533 = vsyncpa [#allocation9], 1 }

</bundles_post_ra>
